<compile_context>
chip_gen: v6e
topology: v6e:2x2x1
jax: 0.10.0
libtpu: 0.0.40
codegen_flags: <defaults>
</compile_context>

<pallas_src>
import functools

import jax
import jax.numpy as jnp
from jax import lax
from jax.experimental import pallas as pl
from jax.experimental.pallas import tpu as pltpu

EPS = 1e-12  # F.normalize default eps


# ---------------------------------------------------------------------------
# Fused kernel: RMSNorm + to_qkv + linear attention (all heads) + to_out + RMSNorm
# One grid step per batch element.
# ---------------------------------------------------------------------------
def _fused_linattn_kernel(x_ref, gq_ref, wqkv_ref, mk_ref, mv_ref,
                          wout_ref, bout_ref, go_ref, o_ref,
                          *, heads, dim_head, scale):
    C = x_ref.shape[1]
    N = x_ref.shape[2]
    hidden = heads * dim_head

    # ---- RMSNorm(dim) (F.normalize over channels, g*sqrt(C) prefolded) ----
    x = x_ref[0]                                            # (C, N)
    sumsq = jnp.sum(x * x, axis=0, keepdims=True)           # (1, N)
    inv = pl.reciprocal(jnp.maximum(jnp.sqrt(sumsq), EPS), approx=False)
    xn = x * inv * gq_ref[...]                              # (C, N)

    # ---- to_qkv 1x1 conv: (3*hidden, C) @ (C, N) --------------------------
    # TODO(synk): cast matmul inputs to bf16 on v6e/v7x for MXU peak; kept f32
    # here to preserve 1e-4 parity with the f32 reference.
    qkv = lax.dot_general(wqkv_ref[...], xn,
                          (((1,), (0,)), ((), ())),
                          preferred_element_type=jnp.float32)   # (3*hidden, N)

    wout = wout_ref[...]                                    # (C, hidden)
    mk = mk_ref[...]                                        # (heads, d, M)
    mv = mv_ref[...]                                        # (heads, d, M)

    # ---- per-head linear attention + folded to_out contribution ----------
    y = jnp.zeros((C, N), jnp.float32)
    for h in range(heads):                                  # static unroll
        lo = h * dim_head
        q = qkv[lo:lo + dim_head, :]                        # (d, N)
        k = qkv[hidden + lo:hidden + lo + dim_head, :]      # (d, N)
        v = qkv[2 * hidden + lo:2 * hidden + lo + dim_head, :]
        mk_h = mk[h]                                        # (d, M)
        mv_h = mv[h]                                        # (d, M)

        # q softmax over dim_head (sublane axis), then * scale
        qmax = jnp.max(q, axis=0, keepdims=True)            # (1, N)
        eq = jnp.exp(q - qmax)
        qs = eq * (pl.reciprocal(jnp.sum(eq, axis=0, keepdims=True),
                                 approx=False) * scale)     # (d, N)

        # k softmax over n (lanes), memory-kv columns folded in analytically
        kmax = jnp.maximum(jnp.max(k, axis=1, keepdims=True),
                           jnp.max(mk_h, axis=1, keepdims=True))   # (d, 1)
        ek = jnp.exp(k - kmax)                              # (d, N)
        em = jnp.exp(mk_h - kmax)                           # (d, M)
        kden = (jnp.sum(ek, axis=1, keepdims=True)
                + jnp.sum(em, axis=1, keepdims=True))       # (d, 1)
        inv_kden = pl.reciprocal(kden, approx=False)

        # context[d, e] = sum_n k_soft[d, n] * v[e, n]   (no transposes)
        ctx = (lax.dot_general(ek, v, (((1,), (1,)), ((), ())),
                               preferred_element_type=jnp.float32)
               + lax.dot_general(em, mv_h, (((1,), (1,)), ((), ())),
                                 preferred_element_type=jnp.float32))
        ctx = ctx * inv_kden                                # (d, d)

        # out[e, n] = sum_d ctx[d, e] * qs[d, n]
        out_h = lax.dot_general(ctx, qs, (((0,), (0,)), ((), ())),
                                preferred_element_type=jnp.float32)  # (d, N)

        # to_out 1x1 conv, this head's slice: (C, d) @ (d, N)
        y = y + lax.dot_general(wout[:, lo:lo + dim_head], out_h,
                                (((1,), (0,)), ((), ())),
                                preferred_element_type=jnp.float32)

    # ---- to_out bias + RMSNorm(dim) ---------------------------------------
    y = y + bout_ref[...]
    sumsq2 = jnp.sum(y * y, axis=0, keepdims=True)
    inv2 = pl.reciprocal(jnp.maximum(jnp.sqrt(sumsq2), EPS), approx=False)
    o_ref[0] = y * inv2 * go_ref[...]


# ---------------------------------------------------------------------------
# Wrapper
# ---------------------------------------------------------------------------
def linear_attention(x, params, *, heads, dim_head):
    B, C, H, W = x.shape
    N = H * W
    hidden = heads * dim_head
    M = params["mem_kv"].shape[-1]
    rms_scale = float(C) ** 0.5

    x_flat = x.reshape(B, C, N).astype(jnp.float32)
    g_scaled = (params["norm_g"] * rms_scale).astype(jnp.float32)        # (C, 1)
    go_scaled = (params["out_norm_g"] * rms_scale).astype(jnp.float32)   # (C, 1)
    mem_k = params["mem_kv"][0].astype(jnp.float32)                      # (heads, d, M)
    mem_v = params["mem_kv"][1].astype(jnp.float32)

    kernel = functools.partial(_fused_linattn_kernel, heads=heads,
                               dim_head=dim_head,
                               scale=float(dim_head) ** -0.5)

    y = pl.pallas_call(
        kernel,
        out_shape=jax.ShapeDtypeStruct((B, C, N), jnp.float32),
        grid=(B,),
        in_specs=[
            pl.BlockSpec((1, C, N), lambda b: (b, 0, 0)),                # x
            pl.BlockSpec((C, 1), lambda b: (0, 0)),                      # norm g*scale
            pl.BlockSpec((3 * hidden, C), lambda b: (0, 0)),             # to_qkv w
            pl.BlockSpec((heads, dim_head, M), lambda b: (0, 0, 0)),     # mem_k
            pl.BlockSpec((heads, dim_head, M), lambda b: (0, 0, 0)),     # mem_v
            pl.BlockSpec((C, hidden), lambda b: (0, 0)),                 # to_out w
            pl.BlockSpec((C, 1), lambda b: (0, 0)),                      # to_out b
            pl.BlockSpec((C, 1), lambda b: (0, 0)),                      # out norm g*scale
        ],
        out_specs=pl.BlockSpec((1, C, N), lambda b: (b, 0, 0)),
        compiler_params=pltpu.CompilerParams(dimension_semantics=("parallel",)),
    )(x_flat, g_scaled, params["to_qkv_w"], mem_k, mem_v,
      params["to_out_w"], params["to_out_b"], go_scaled)

    return y.reshape(B, C, H, W)


# ---------------------------------------------------------------------------
# Pure-JAX reference (mirrors the PyTorch forward) for correctness checking
# ---------------------------------------------------------------------------
def linear_attention_ref(x, params, *, heads, dim_head):
    B, C, H, W = x.shape
    N = H * W
    hidden = heads * dim_head
    rms_scale = float(C) ** 0.5

    n = jnp.sqrt(jnp.sum(x * x, axis=1, keepdims=True))
    xn = x / jnp.maximum(n, EPS) * params["norm_g"].reshape(1, C, 1, 1) * rms_scale

    qkv = jnp.einsum("oc,bchw->bohw", params["to_qkv_w"], xn)
    qkv = qkv.reshape(B, 3, heads, dim_head, N)
    q, k, v = qkv[:, 0], qkv[:, 1], qkv[:, 2]

    M = params["mem_kv"].shape[-1]
    mk = jnp.broadcast_to(params["mem_kv"][0], (B, heads, dim_head, M))
    mv = jnp.broadcast_to(params["mem_kv"][1], (B, heads, dim_head, M))
    k = jnp.concatenate([mk, k], axis=-1)
    v = jnp.concatenate([mv, v], axis=-1)

    q = jax.nn.softmax(q, axis=-2) * float(dim_head) ** -0.5
    k = jax.nn.softmax(k, axis=-1)
    context = jnp.einsum("bhdn,bhen->bhde", k, v)
    out = jnp.einsum("bhde,bhdn->bhen", context, q)
    out = out.reshape(B, hidden, H, W)

    y = jnp.einsum("oc,bchw->bohw", params["to_out_w"], out) \
        + params["to_out_b"].reshape(1, C, 1, 1)
    n2 = jnp.sqrt(jnp.sum(y * y, axis=1, keepdims=True))
    return y / jnp.maximum(n2, EPS) * params["out_norm_g"].reshape(1, C, 1, 1) * rms_scale


if __name__ == "__main__":
    # Small shapes consistent with the module
    B, dim, H, W = 2, 8, 16, 16
    heads, dim_head, num_mem_kv = 4, 32, 4
    hidden = heads * dim_head

    key = jax.random.PRNGKey(0)
    kx, k1, k2, k3, k4 = jax.random.split(key, 5)

    x = jax.random.normal(kx, (B, dim, H, W), dtype=jnp.float32)

    params = {
        "norm_g": jnp.ones((dim, 1), jnp.float32),                  # RMSNorm.g (ones init)
        "to_qkv_w": 0.1 * jax.random.normal(k1, (3 * hidden, dim), jnp.float32),
        "mem_kv": jax.random.normal(k2, (2, heads, dim_head, num_mem_kv), jnp.float32),
        "to_out_w": 0.1 * jax.random.normal(k3, (dim, hidden), jnp.float32),
        "to_out_b": 0.1 * jax.random.normal(k4, (dim, 1), jnp.float32),
        "out_norm_g": jnp.ones((dim, 1), jnp.float32),
    }

    out = linear_attention(x, params, heads=heads, dim_head=dim_head)
    out = jax.block_until_ready(out)

    ref = linear_attention_ref(x, params, heads=heads, dim_head=dim_head)
    assert out.shape == (B, dim, H, W)
    assert jnp.allclose(out, ref, atol=1e-4, rtol=1e-4), "mismatch vs reference"

    print("KERNEL_OK")
</pallas_src>

<mosaic_0001>
module attributes {stable_mosaic.version = 11 : i64} {
  func.func @_fused_linattn_kernel(%arg0: i32, %arg1: memref<1x8x256xf32, #tpu.memory_space<vmem>>, %arg2: memref<8x1xf32, #tpu.memory_space<vmem>>, %arg3: memref<384x8xf32, #tpu.memory_space<vmem>>, %arg4: memref<4x32x4xf32, #tpu.memory_space<vmem>>, %arg5: memref<4x32x4xf32, #tpu.memory_space<vmem>>, %arg6: memref<8x128xf32, #tpu.memory_space<vmem>>, %arg7: memref<8x1xf32, #tpu.memory_space<vmem>>, %arg8: memref<8x1xf32, #tpu.memory_space<vmem>>, %arg9: memref<1x8x256xf32, #tpu.memory_space<vmem>>) attributes {dimension_semantics = [#tpu.dimension_semantics<parallel>], iteration_bounds = array<i64: 2>, scalar_prefetch = 0 : i64, scratch_operands = 0 : i64, tpu.core_type = #tpu.core_type<tc>, window_params = [{transform_indices = @transform_0, window_bounds = array<i64: 1, 8, 256>}, {pipeline_mode = #tpu.pipeline_mode<synchronous>, transform_indices = @transform_1, window_bounds = array<i64: 8, 1>}, {pipeline_mode = #tpu.pipeline_mode<synchronous>, transform_indices = @transform_2, window_bounds = array<i64: 384, 8>}, {pipeline_mode = #tpu.pipeline_mode<synchronous>, transform_indices = @transform_3, window_bounds = array<i64: 4, 32, 4>}, {pipeline_mode = #tpu.pipeline_mode<synchronous>, transform_indices = @transform_4, window_bounds = array<i64: 4, 32, 4>}, {pipeline_mode = #tpu.pipeline_mode<synchronous>, transform_indices = @transform_5, window_bounds = array<i64: 8, 128>}, {pipeline_mode = #tpu.pipeline_mode<synchronous>, transform_indices = @transform_6, window_bounds = array<i64: 8, 1>}, {pipeline_mode = #tpu.pipeline_mode<synchronous>, transform_indices = @transform_7, window_bounds = array<i64: 8, 1>}, {transform_indices = @transform_8, window_bounds = array<i64: 1, 8, 256>}]} {
    %c0 = arith.constant 0 : index
    %c0_0 = arith.constant 0 : index
    %c0_1 = arith.constant 0 : index
    %0 = vector.load %arg1[%c0, %c0_0, %c0_1] : memref<1x8x256xf32, #tpu.memory_space<vmem>>, vector<1x8x256xf32>
    %1 = vector.shape_cast %0 : vector<1x8x256xf32> to vector<8x256xf32>
    %2 = arith.mulf %1, %1 : vector<8x256xf32>
    %cst = arith.constant dense<0.000000e+00> : vector<256xf32>
    %3 = vector.multi_reduction <add>, %2, %cst [0] : vector<8x256xf32> to vector<256xf32>
    %4 = vector.shape_cast %3 : vector<256xf32> to vector<1x256xf32>
    %5 = math.sqrt %4 : vector<1x256xf32>
    %cst_2 = arith.constant 9.99999996E-13 : f32
    %6 = vector.broadcast %cst_2 : f32 to vector<1x256xf32>
    %7 = arith.maximumf %5, %6 : vector<1x256xf32>
    %8 = tpu.reciprocal %7 : vector<1x256xf32> -> vector<1x256xf32>
    %9 = vector.broadcast %8 : vector<1x256xf32> to vector<8x256xf32>
    %10 = arith.mulf %1, %9 : vector<8x256xf32>
    %c0_3 = arith.constant 0 : index
    %c0_4 = arith.constant 0 : index
    %11 = vector.load %arg2[%c0_3, %c0_4] : memref<8x1xf32, #tpu.memory_space<vmem>>, vector<8x1xf32>
    %12 = vector.broadcast %11 : vector<8x1xf32> to vector<8x256xf32>
    %13 = arith.mulf %10, %12 : vector<8x256xf32>
    %c0_5 = arith.constant 0 : index
    %c0_6 = arith.constant 0 : index
    %14 = vector.load %arg3[%c0_5, %c0_6] : memref<384x8xf32, #tpu.memory_space<vmem>>, vector<384x8xf32>
    %cst_7 = arith.constant dense<0.000000e+00> : vector<384x256xf32>
    %15 = tpu.matmul %14, %13, %cst_7 {dimension_numbers = #tpu.dot_dimension_numbers<[1], [0], [0], [1], [0, 0, 1, 1], [], []>} : vector<384x8xf32>, vector<8x256xf32>, vector<384x256xf32> -> vector<384x256xf32>
    %c0_8 = arith.constant 0 : index
    %c0_9 = arith.constant 0 : index
    %16 = vector.load %arg6[%c0_8, %c0_9] : memref<8x128xf32, #tpu.memory_space<vmem>>, vector<8x128xf32>
    %c0_10 = arith.constant 0 : index
    %c0_11 = arith.constant 0 : index
    %c0_12 = arith.constant 0 : index
    %17 = vector.load %arg4[%c0_10, %c0_11, %c0_12] : memref<4x32x4xf32, #tpu.memory_space<vmem>>, vector<4x32x4xf32>
    %c0_13 = arith.constant 0 : index
    %c0_14 = arith.constant 0 : index
    %c0_15 = arith.constant 0 : index
    %18 = vector.load %arg5[%c0_13, %c0_14, %c0_15] : memref<4x32x4xf32, #tpu.memory_space<vmem>>, vector<4x32x4xf32>
    %cst_16 = arith.constant 0.000000e+00 : f32
    %19 = vector.broadcast %cst_16 : f32 to vector<8x256xf32>
    %20 = vector.extract_strided_slice %15 {offsets = [0, 0], sizes = [32, 256], strides = [1, 1]} : vector<384x256xf32> to vector<32x256xf32>
    %21 = vector.extract_strided_slice %15 {offsets = [128, 0], sizes = [32, 256], strides = [1, 1]} : vector<384x256xf32> to vector<32x256xf32>
    %22 = vector.extract_strided_slice %15 {offsets = [256, 0], sizes = [32, 256], strides = [1, 1]} : vector<384x256xf32> to vector<32x256xf32>
    %23 = vector.extract_strided_slice %17 {offsets = [0, 0, 0], sizes = [1, 32, 4], strides = [1, 1, 1]} : vector<4x32x4xf32> to vector<1x32x4xf32>
    %24 = vector.shape_cast %23 : vector<1x32x4xf32> to vector<32x4xf32>
    %25 = vector.extract_strided_slice %18 {offsets = [0, 0, 0], sizes = [1, 32, 4], strides = [1, 1, 1]} : vector<4x32x4xf32> to vector<1x32x4xf32>
    %26 = vector.shape_cast %25 : vector<1x32x4xf32> to vector<32x4xf32>
    %cst_17 = arith.constant dense<0xFF800000> : vector<256xf32>
    %27 = vector.multi_reduction <maximumf>, %20, %cst_17 [0] : vector<32x256xf32> to vector<256xf32>
    %28 = vector.shape_cast %27 : vector<256xf32> to vector<1x256xf32>
    %29 = vector.broadcast %28 : vector<1x256xf32> to vector<32x256xf32>
    %30 = arith.subf %20, %29 : vector<32x256xf32>
    %31 = math.exp %30 : vector<32x256xf32>
    %cst_18 = arith.constant dense<0.000000e+00> : vector<256xf32>
    %32 = vector.multi_reduction <add>, %31, %cst_18 [0] : vector<32x256xf32> to vector<256xf32>
    %33 = vector.shape_cast %32 : vector<256xf32> to vector<1x256xf32>
    %34 = tpu.reciprocal %33 : vector<1x256xf32> -> vector<1x256xf32>
    %cst_19 = arith.constant 0.176776692 : f32
    %35 = vector.broadcast %cst_19 : f32 to vector<1x256xf32>
    %36 = arith.mulf %34, %35 : vector<1x256xf32>
    %37 = vector.broadcast %36 : vector<1x256xf32> to vector<32x256xf32>
    %38 = arith.mulf %31, %37 : vector<32x256xf32>
    %cst_20 = arith.constant dense<0xFF800000> : vector<32xf32>
    %39 = vector.multi_reduction <maximumf>, %21, %cst_20 [1] : vector<32x256xf32> to vector<32xf32>
    %40 = vector.shape_cast %39 : vector<32xf32> to vector<32x1xf32>
    %cst_21 = arith.constant dense<0xFF800000> : vector<32xf32>
    %41 = vector.multi_reduction <maximumf>, %24, %cst_21 [1] : vector<32x4xf32> to vector<32xf32>
    %42 = vector.shape_cast %41 : vector<32xf32> to vector<32x1xf32>
    %43 = arith.maximumf %40, %42 : vector<32x1xf32>
    %44 = vector.broadcast %43 : vector<32x1xf32> to vector<32x256xf32>
    %45 = arith.subf %21, %44 : vector<32x256xf32>
    %46 = math.exp %45 : vector<32x256xf32>
    %47 = vector.broadcast %43 : vector<32x1xf32> to vector<32x4xf32>
    %48 = arith.subf %24, %47 : vector<32x4xf32>
    %49 = math.exp %48 : vector<32x4xf32>
    %cst_22 = arith.constant dense<0.000000e+00> : vector<32xf32>
    %50 = vector.multi_reduction <add>, %46, %cst_22 [1] : vector<32x256xf32> to vector<32xf32>
    %51 = vector.shape_cast %50 : vector<32xf32> to vector<32x1xf32>
    %cst_23 = arith.constant dense<0.000000e+00> : vector<32xf32>
    %52 = vector.multi_reduction <add>, %49, %cst_23 [1] : vector<32x4xf32> to vector<32xf32>
    %53 = vector.shape_cast %52 : vector<32xf32> to vector<32x1xf32>
    %54 = arith.addf %51, %53 : vector<32x1xf32>
    %55 = tpu.reciprocal %54 : vector<32x1xf32> -> vector<32x1xf32>
    %cst_24 = arith.constant dense<0.000000e+00> : vector<32x32xf32>
    %56 = tpu.matmul %46, %22, %cst_24 {dimension_numbers = #tpu.dot_dimension_numbers<[1], [1], [0], [0], [0, 0, 1, 0], [], []>} : vector<32x256xf32>, vector<32x256xf32>, vector<32x32xf32> -> vector<32x32xf32>
    %cst_25 = arith.constant dense<0.000000e+00> : vector<32x32xf32>
    %57 = tpu.matmul %49, %26, %cst_25 {dimension_numbers = #tpu.dot_dimension_numbers<[1], [1], [0], [0], [0, 0, 1, 0], [], []>} : vector<32x4xf32>, vector<32x4xf32>, vector<32x32xf32> -> vector<32x32xf32>
    %58 = arith.addf %56, %57 : vector<32x32xf32>
    %59 = vector.broadcast %55 : vector<32x1xf32> to vector<32x32xf32>
    %60 = arith.mulf %58, %59 : vector<32x32xf32>
    %cst_26 = arith.constant dense<0.000000e+00> : vector<32x256xf32>
    %61 = tpu.matmul %60, %38, %cst_26 {dimension_numbers = #tpu.dot_dimension_numbers<[0], [0], [1], [1], [0, 1, 1, 1], [], []>} : vector<32x32xf32>, vector<32x256xf32>, vector<32x256xf32> -> vector<32x256xf32>
    %62 = vector.extract_strided_slice %16 {offsets = [0, 0], sizes = [8, 32], strides = [1, 1]} : vector<8x128xf32> to vector<8x32xf32>
    %cst_27 = arith.constant dense<0.000000e+00> : vector<8x256xf32>
    %63 = tpu.matmul %62, %61, %cst_27 {dimension_numbers = #tpu.dot_dimension_numbers<[1], [0], [0], [1], [0, 0, 1, 1], [], []>} : vector<8x32xf32>, vector<32x256xf32>, vector<8x256xf32> -> vector<8x256xf32>
    %64 = arith.addf %19, %63 : vector<8x256xf32>
    %65 = vector.extract_strided_slice %15 {offsets = [32, 0], sizes = [32, 256], strides = [1, 1]} : vector<384x256xf32> to vector<32x256xf32>
    %66 = vector.extract_strided_slice %15 {offsets = [160, 0], sizes = [32, 256], strides = [1, 1]} : vector<384x256xf32> to vector<32x256xf32>
    %67 = vector.extract_strided_slice %15 {offsets = [288, 0], sizes = [32, 256], strides = [1, 1]} : vector<384x256xf32> to vector<32x256xf32>
    %68 = vector.extract_strided_slice %17 {offsets = [1, 0, 0], sizes = [1, 32, 4], strides = [1, 1, 1]} : vector<4x32x4xf32> to vector<1x32x4xf32>
    %69 = vector.shape_cast %68 : vector<1x32x4xf32> to vector<32x4xf32>
    %70 = vector.extract_strided_slice %18 {offsets = [1, 0, 0], sizes = [1, 32, 4], strides = [1, 1, 1]} : vector<4x32x4xf32> to vector<1x32x4xf32>
    %71 = vector.shape_cast %70 : vector<1x32x4xf32> to vector<32x4xf32>
    %cst_28 = arith.constant dense<0xFF800000> : vector<256xf32>
    %72 = vector.multi_reduction <maximumf>, %65, %cst_28 [0] : vector<32x256xf32> to vector<256xf32>
    %73 = vector.shape_cast %72 : vector<256xf32> to vector<1x256xf32>
    %74 = vector.broadcast %73 : vector<1x256xf32> to vector<32x256xf32>
    %75 = arith.subf %65, %74 : vector<32x256xf32>
    %76 = math.exp %75 : vector<32x256xf32>
    %cst_29 = arith.constant dense<0.000000e+00> : vector<256xf32>
    %77 = vector.multi_reduction <add>, %76, %cst_29 [0] : vector<32x256xf32> to vector<256xf32>
    %78 = vector.shape_cast %77 : vector<256xf32> to vector<1x256xf32>
    %79 = tpu.reciprocal %78 : vector<1x256xf32> -> vector<1x256xf32>
    %cst_30 = arith.constant 0.176776692 : f32
    %80 = vector.broadcast %cst_30 : f32 to vector<1x256xf32>
    %81 = arith.mulf %79, %80 : vector<1x256xf32>
    %82 = vector.broadcast %81 : vector<1x256xf32> to vector<32x256xf32>
    %83 = arith.mulf %76, %82 : vector<32x256xf32>
    %cst_31 = arith.constant dense<0xFF800000> : vector<32xf32>
    %84 = vector.multi_reduction <maximumf>, %66, %cst_31 [1] : vector<32x256xf32> to vector<32xf32>
    %85 = vector.shape_cast %84 : vector<32xf32> to vector<32x1xf32>
    %cst_32 = arith.constant dense<0xFF800000> : vector<32xf32>
    %86 = vector.multi_reduction <maximumf>, %69, %cst_32 [1] : vector<32x4xf32> to vector<32xf32>
    %87 = vector.shape_cast %86 : vector<32xf32> to vector<32x1xf32>
    %88 = arith.maximumf %85, %87 : vector<32x1xf32>
    %89 = vector.broadcast %88 : vector<32x1xf32> to vector<32x256xf32>
    %90 = arith.subf %66, %89 : vector<32x256xf32>
    %91 = math.exp %90 : vector<32x256xf32>
    %92 = vector.broadcast %88 : vector<32x1xf32> to vector<32x4xf32>
    %93 = arith.subf %69, %92 : vector<32x4xf32>
    %94 = math.exp %93 : vector<32x4xf32>
    %cst_33 = arith.constant dense<0.000000e+00> : vector<32xf32>
    %95 = vector.multi_reduction <add>, %91, %cst_33 [1] : vector<32x256xf32> to vector<32xf32>
    %96 = vector.shape_cast %95 : vector<32xf32> to vector<32x1xf32>
    %cst_34 = arith.constant dense<0.000000e+00> : vector<32xf32>
    %97 = vector.multi_reduction <add>, %94, %cst_34 [1] : vector<32x4xf32> to vector<32xf32>
    %98 = vector.shape_cast %97 : vector<32xf32> to vector<32x1xf32>
    %99 = arith.addf %96, %98 : vector<32x1xf32>
    %100 = tpu.reciprocal %99 : vector<32x1xf32> -> vector<32x1xf32>
    %cst_35 = arith.constant dense<0.000000e+00> : vector<32x32xf32>
    %101 = tpu.matmul %91, %67, %cst_35 {dimension_numbers = #tpu.dot_dimension_numbers<[1], [1], [0], [0], [0, 0, 1, 0], [], []>} : vector<32x256xf32>, vector<32x256xf32>, vector<32x32xf32> -> vector<32x32xf32>
    %cst_36 = arith.constant dense<0.000000e+00> : vector<32x32xf32>
    %102 = tpu.matmul %94, %71, %cst_36 {dimension_numbers = #tpu.dot_dimension_numbers<[1], [1], [0], [0], [0, 0, 1, 0], [], []>} : vector<32x4xf32>, vector<32x4xf32>, vector<32x32xf32> -> vector<32x32xf32>
    %103 = arith.addf %101, %102 : vector<32x32xf32>
    %104 = vector.broadcast %100 : vector<32x1xf32> to vector<32x32xf32>
    %105 = arith.mulf %103, %104 : vector<32x32xf32>
    %cst_37 = arith.constant dense<0.000000e+00> : vector<32x256xf32>
    %106 = tpu.matmul %105, %83, %cst_37 {dimension_numbers = #tpu.dot_dimension_numbers<[0], [0], [1], [1], [0, 1, 1, 1], [], []>} : vector<32x32xf32>, vector<32x256xf32>, vector<32x256xf32> -> vector<32x256xf32>
    %107 = vector.extract_strided_slice %16 {offsets = [0, 32], sizes = [8, 32], strides = [1, 1]} : vector<8x128xf32> to vector<8x32xf32>
    %cst_38 = arith.constant dense<0.000000e+00> : vector<8x256xf32>
    %108 = tpu.matmul %107, %106, %cst_38 {dimension_numbers = #tpu.dot_dimension_numbers<[1], [0], [0], [1], [0, 0, 1, 1], [], []>} : vector<8x32xf32>, vector<32x256xf32>, vector<8x256xf32> -> vector<8x256xf32>
    %109 = arith.addf %64, %108 : vector<8x256xf32>
    %110 = vector.extract_strided_slice %15 {offsets = [64, 0], sizes = [32, 256], strides = [1, 1]} : vector<384x256xf32> to vector<32x256xf32>
    %111 = vector.extract_strided_slice %15 {offsets = [192, 0], sizes = [32, 256], strides = [1, 1]} : vector<384x256xf32> to vector<32x256xf32>
    %112 = vector.extract_strided_slice %15 {offsets = [320, 0], sizes = [32, 256], strides = [1, 1]} : vector<384x256xf32> to vector<32x256xf32>
    %113 = vector.extract_strided_slice %17 {offsets = [2, 0, 0], sizes = [1, 32, 4], strides = [1, 1, 1]} : vector<4x32x4xf32> to vector<1x32x4xf32>
    %114 = vector.shape_cast %113 : vector<1x32x4xf32> to vector<32x4xf32>
    %115 = vector.extract_strided_slice %18 {offsets = [2, 0, 0], sizes = [1, 32, 4], strides = [1, 1, 1]} : vector<4x32x4xf32> to vector<1x32x4xf32>
    %116 = vector.shape_cast %115 : vector<1x32x4xf32> to vector<32x4xf32>
    %cst_39 = arith.constant dense<0xFF800000> : vector<256xf32>
    %117 = vector.multi_reduction <maximumf>, %110, %cst_39 [0] : vector<32x256xf32> to vector<256xf32>
    %118 = vector.shape_cast %117 : vector<256xf32> to vector<1x256xf32>
    %119 = vector.broadcast %118 : vector<1x256xf32> to vector<32x256xf32>
    %120 = arith.subf %110, %119 : vector<32x256xf32>
    %121 = math.exp %120 : vector<32x256xf32>
    %cst_40 = arith.constant dense<0.000000e+00> : vector<256xf32>
    %122 = vector.multi_reduction <add>, %121, %cst_40 [0] : vector<32x256xf32> to vector<256xf32>
    %123 = vector.shape_cast %122 : vector<256xf32> to vector<1x256xf32>
    %124 = tpu.reciprocal %123 : vector<1x256xf32> -> vector<1x256xf32>
    %cst_41 = arith.constant 0.176776692 : f32
    %125 = vector.broadcast %cst_41 : f32 to vector<1x256xf32>
    %126 = arith.mulf %124, %125 : vector<1x256xf32>
    %127 = vector.broadcast %126 : vector<1x256xf32> to vector<32x256xf32>
    %128 = arith.mulf %121, %127 : vector<32x256xf32>
    %cst_42 = arith.constant dense<0xFF800000> : vector<32xf32>
    %129 = vector.multi_reduction <maximumf>, %111, %cst_42 [1] : vector<32x256xf32> to vector<32xf32>
    %130 = vector.shape_cast %129 : vector<32xf32> to vector<32x1xf32>
    %cst_43 = arith.constant dense<0xFF800000> : vector<32xf32>
    %131 = vector.multi_reduction <maximumf>, %114, %cst_43 [1] : vector<32x4xf32> to vector<32xf32>
    %132 = vector.shape_cast %131 : vector<32xf32> to vector<32x1xf32>
    %133 = arith.maximumf %130, %132 : vector<32x1xf32>
    %134 = vector.broadcast %133 : vector<32x1xf32> to vector<32x256xf32>
    %135 = arith.subf %111, %134 : vector<32x256xf32>
    %136 = math.exp %135 : vector<32x256xf32>
    %137 = vector.broadcast %133 : vector<32x1xf32> to vector<32x4xf32>
    %138 = arith.subf %114, %137 : vector<32x4xf32>
    %139 = math.exp %138 : vector<32x4xf32>
    %cst_44 = arith.constant dense<0.000000e+00> : vector<32xf32>
    %140 = vector.multi_reduction <add>, %136, %cst_44 [1] : vector<32x256xf32> to vector<32xf32>
    %141 = vector.shape_cast %140 : vector<32xf32> to vector<32x1xf32>
    %cst_45 = arith.constant dense<0.000000e+00> : vector<32xf32>
    %142 = vector.multi_reduction <add>, %139, %cst_45 [1] : vector<32x4xf32> to vector<32xf32>
    %143 = vector.shape_cast %142 : vector<32xf32> to vector<32x1xf32>
    %144 = arith.addf %141, %143 : vector<32x1xf32>
    %145 = tpu.reciprocal %144 : vector<32x1xf32> -> vector<32x1xf32>
    %cst_46 = arith.constant dense<0.000000e+00> : vector<32x32xf32>
    %146 = tpu.matmul %136, %112, %cst_46 {dimension_numbers = #tpu.dot_dimension_numbers<[1], [1], [0], [0], [0, 0, 1, 0], [], []>} : vector<32x256xf32>, vector<32x256xf32>, vector<32x32xf32> -> vector<32x32xf32>
    %cst_47 = arith.constant dense<0.000000e+00> : vector<32x32xf32>
    %147 = tpu.matmul %139, %116, %cst_47 {dimension_numbers = #tpu.dot_dimension_numbers<[1], [1], [0], [0], [0, 0, 1, 0], [], []>} : vector<32x4xf32>, vector<32x4xf32>, vector<32x32xf32> -> vector<32x32xf32>
    %148 = arith.addf %146, %147 : vector<32x32xf32>
    %149 = vector.broadcast %145 : vector<32x1xf32> to vector<32x32xf32>
    %150 = arith.mulf %148, %149 : vector<32x32xf32>
    %cst_48 = arith.constant dense<0.000000e+00> : vector<32x256xf32>
    %151 = tpu.matmul %150, %128, %cst_48 {dimension_numbers = #tpu.dot_dimension_numbers<[0], [0], [1], [1], [0, 1, 1, 1], [], []>} : vector<32x32xf32>, vector<32x256xf32>, vector<32x256xf32> -> vector<32x256xf32>
    %152 = vector.extract_strided_slice %16 {offsets = [0, 64], sizes = [8, 32], strides = [1, 1]} : vector<8x128xf32> to vector<8x32xf32>
    %cst_49 = arith.constant dense<0.000000e+00> : vector<8x256xf32>
    %153 = tpu.matmul %152, %151, %cst_49 {dimension_numbers = #tpu.dot_dimension_numbers<[1], [0], [0], [1], [0, 0, 1, 1], [], []>} : vector<8x32xf32>, vector<32x256xf32>, vector<8x256xf32> -> vector<8x256xf32>
    %154 = arith.addf %109, %153 : vector<8x256xf32>
    %155 = vector.extract_strided_slice %15 {offsets = [96, 0], sizes = [32, 256], strides = [1, 1]} : vector<384x256xf32> to vector<32x256xf32>
    %156 = vector.extract_strided_slice %15 {offsets = [224, 0], sizes = [32, 256], strides = [1, 1]} : vector<384x256xf32> to vector<32x256xf32>
    %157 = vector.extract_strided_slice %15 {offsets = [352, 0], sizes = [32, 256], strides = [1, 1]} : vector<384x256xf32> to vector<32x256xf32>
    %158 = vector.extract_strided_slice %17 {offsets = [3, 0, 0], sizes = [1, 32, 4], strides = [1, 1, 1]} : vector<4x32x4xf32> to vector<1x32x4xf32>
    %159 = vector.shape_cast %158 : vector<1x32x4xf32> to vector<32x4xf32>
    %160 = vector.extract_strided_slice %18 {offsets = [3, 0, 0], sizes = [1, 32, 4], strides = [1, 1, 1]} : vector<4x32x4xf32> to vector<1x32x4xf32>
    %161 = vector.shape_cast %160 : vector<1x32x4xf32> to vector<32x4xf32>
    %cst_50 = arith.constant dense<0xFF800000> : vector<256xf32>
    %162 = vector.multi_reduction <maximumf>, %155, %cst_50 [0] : vector<32x256xf32> to vector<256xf32>
    %163 = vector.shape_cast %162 : vector<256xf32> to vector<1x256xf32>
    %164 = vector.broadcast %163 : vector<1x256xf32> to vector<32x256xf32>
    %165 = arith.subf %155, %164 : vector<32x256xf32>
    %166 = math.exp %165 : vector<32x256xf32>
    %cst_51 = arith.constant dense<0.000000e+00> : vector<256xf32>
    %167 = vector.multi_reduction <add>, %166, %cst_51 [0] : vector<32x256xf32> to vector<256xf32>
    %168 = vector.shape_cast %167 : vector<256xf32> to vector<1x256xf32>
    %169 = tpu.reciprocal %168 : vector<1x256xf32> -> vector<1x256xf32>
    %cst_52 = arith.constant 0.176776692 : f32
    %170 = vector.broadcast %cst_52 : f32 to vector<1x256xf32>
    %171 = arith.mulf %169, %170 : vector<1x256xf32>
    %172 = vector.broadcast %171 : vector<1x256xf32> to vector<32x256xf32>
    %173 = arith.mulf %166, %172 : vector<32x256xf32>
    %cst_53 = arith.constant dense<0xFF800000> : vector<32xf32>
    %174 = vector.multi_reduction <maximumf>, %156, %cst_53 [1] : vector<32x256xf32> to vector<32xf32>
    %175 = vector.shape_cast %174 : vector<32xf32> to vector<32x1xf32>
    %cst_54 = arith.constant dense<0xFF800000> : vector<32xf32>
    %176 = vector.multi_reduction <maximumf>, %159, %cst_54 [1] : vector<32x4xf32> to vector<32xf32>
    %177 = vector.shape_cast %176 : vector<32xf32> to vector<32x1xf32>
    %178 = arith.maximumf %175, %177 : vector<32x1xf32>
    %179 = vector.broadcast %178 : vector<32x1xf32> to vector<32x256xf32>
    %180 = arith.subf %156, %179 : vector<32x256xf32>
    %181 = math.exp %180 : vector<32x256xf32>
    %182 = vector.broadcast %178 : vector<32x1xf32> to vector<32x4xf32>
    %183 = arith.subf %159, %182 : vector<32x4xf32>
    %184 = math.exp %183 : vector<32x4xf32>
    %cst_55 = arith.constant dense<0.000000e+00> : vector<32xf32>
    %185 = vector.multi_reduction <add>, %181, %cst_55 [1] : vector<32x256xf32> to vector<32xf32>
    %186 = vector.shape_cast %185 : vector<32xf32> to vector<32x1xf32>
    %cst_56 = arith.constant dense<0.000000e+00> : vector<32xf32>
    %187 = vector.multi_reduction <add>, %184, %cst_56 [1] : vector<32x4xf32> to vector<32xf32>
    %188 = vector.shape_cast %187 : vector<32xf32> to vector<32x1xf32>
    %189 = arith.addf %186, %188 : vector<32x1xf32>
    %190 = tpu.reciprocal %189 : vector<32x1xf32> -> vector<32x1xf32>
    %cst_57 = arith.constant dense<0.000000e+00> : vector<32x32xf32>
    %191 = tpu.matmul %181, %157, %cst_57 {dimension_numbers = #tpu.dot_dimension_numbers<[1], [1], [0], [0], [0, 0, 1, 0], [], []>} : vector<32x256xf32>, vector<32x256xf32>, vector<32x32xf32> -> vector<32x32xf32>
    %cst_58 = arith.constant dense<0.000000e+00> : vector<32x32xf32>
    %192 = tpu.matmul %184, %161, %cst_58 {dimension_numbers = #tpu.dot_dimension_numbers<[1], [1], [0], [0], [0, 0, 1, 0], [], []>} : vector<32x4xf32>, vector<32x4xf32>, vector<32x32xf32> -> vector<32x32xf32>
    %193 = arith.addf %191, %192 : vector<32x32xf32>
    %194 = vector.broadcast %190 : vector<32x1xf32> to vector<32x32xf32>
    %195 = arith.mulf %193, %194 : vector<32x32xf32>
    %cst_59 = arith.constant dense<0.000000e+00> : vector<32x256xf32>
    %196 = tpu.matmul %195, %173, %cst_59 {dimension_numbers = #tpu.dot_dimension_numbers<[0], [0], [1], [1], [0, 1, 1, 1], [], []>} : vector<32x32xf32>, vector<32x256xf32>, vector<32x256xf32> -> vector<32x256xf32>
    %197 = vector.extract_strided_slice %16 {offsets = [0, 96], sizes = [8, 32], strides = [1, 1]} : vector<8x128xf32> to vector<8x32xf32>
    %cst_60 = arith.constant dense<0.000000e+00> : vector<8x256xf32>
    %198 = tpu.matmul %197, %196, %cst_60 {dimension_numbers = #tpu.dot_dimension_numbers<[1], [0], [0], [1], [0, 0, 1, 1], [], []>} : vector<8x32xf32>, vector<32x256xf32>, vector<8x256xf32> -> vector<8x256xf32>
    %199 = arith.addf %154, %198 : vector<8x256xf32>
    %c0_61 = arith.constant 0 : index
    %c0_62 = arith.constant 0 : index
    %200 = vector.load %arg7[%c0_61, %c0_62] : memref<8x1xf32, #tpu.memory_space<vmem>>, vector<8x1xf32>
    %201 = vector.broadcast %200 : vector<8x1xf32> to vector<8x256xf32>
    %202 = arith.addf %199, %201 : vector<8x256xf32>
    %203 = arith.mulf %202, %202 : vector<8x256xf32>
    %cst_63 = arith.constant dense<0.000000e+00> : vector<256xf32>
    %204 = vector.multi_reduction <add>, %203, %cst_63 [0] : vector<8x256xf32> to vector<256xf32>
    %205 = vector.shape_cast %204 : vector<256xf32> to vector<1x256xf32>
    %206 = math.sqrt %205 : vector<1x256xf32>
    %cst_64 = arith.constant 9.99999996E-13 : f32
    %207 = vector.broadcast %cst_64 : f32 to vector<1x256xf32>
    %208 = arith.maximumf %206, %207 : vector<1x256xf32>
    %209 = tpu.reciprocal %208 : vector<1x256xf32> -> vector<1x256xf32>
    %210 = vector.broadcast %209 : vector<1x256xf32> to vector<8x256xf32>
    %211 = arith.mulf %202, %210 : vector<8x256xf32>
    %c0_65 = arith.constant 0 : index
    %c0_66 = arith.constant 0 : index
    %212 = vector.load %arg8[%c0_65, %c0_66] : memref<8x1xf32, #tpu.memory_space<vmem>>, vector<8x1xf32>
    %213 = vector.broadcast %212 : vector<8x1xf32> to vector<8x256xf32>
    %214 = arith.mulf %211, %213 : vector<8x256xf32>
    %c0_67 = arith.constant 0 : index
    %c0_68 = arith.constant 0 : index
    %c0_69 = arith.constant 0 : index
    %215 = vector.load %arg9[%c0_67, %c0_68, %c0_69] : memref<1x8x256xf32, #tpu.memory_space<vmem>>, vector<1x8x256xf32>
    %216 = vector.shape_cast %215 : vector<1x8x256xf32> to vector<8x256xf32>
    %217 = vector.shape_cast %214 : vector<8x256xf32> to vector<1x8x256xf32>
    tpu.vector_store %arg9[%c0_67, %c0_68, %c0_69], %217 {strides = array<i32>} : memref<1x8x256xf32, #tpu.memory_space<vmem>>, vector<1x8x256xf32>,
    return
  }
  func.func @transform_0(%arg0: i32) -> (i32, i32, i32) {
    %c0_i32 = arith.constant 0 : i32
    %c0_i32_0 = arith.constant 0 : i32
    %c0_i32_1 = arith.constant 0 : i32
    return %arg0, %c0_i32, %c0_i32_0 : i32, i32, i32
  }
  func.func @transform_1(%arg0: i32) -> (i32, i32) {
    %c0_i32 = arith.constant 0 : i32
    %c0_i32_0 = arith.constant 0 : i32
    %c0_i32_1 = arith.constant 0 : i32
    return %c0_i32, %c0_i32_0 : i32, i32
  }
  func.func @transform_2(%arg0: i32) -> (i32, i32) {
    %c0_i32 = arith.constant 0 : i32
    %c0_i32_0 = arith.constant 0 : i32
    %c0_i32_1 = arith.constant 0 : i32
    return %c0_i32, %c0_i32_0 : i32, i32
  }
  func.func @transform_3(%arg0: i32) -> (i32, i32, i32) {
    %c0_i32 = arith.constant 0 : i32
    %c0_i32_0 = arith.constant 0 : i32
    %c0_i32_1 = arith.constant 0 : i32
    %c0_i32_2 = arith.constant 0 : i32
    return %c0_i32, %c0_i32_0, %c0_i32_1 : i32, i32, i32
  }
  func.func @transform_4(%arg0: i32) -> (i32, i32, i32) {
    %c0_i32 = arith.constant 0 : i32
    %c0_i32_0 = arith.constant 0 : i32
    %c0_i32_1 = arith.constant 0 : i32
    %c0_i32_2 = arith.constant 0 : i32
    return %c0_i32, %c0_i32_0, %c0_i32_1 : i32, i32, i32
  }
  func.func @transform_5(%arg0: i32) -> (i32, i32) {
    %c0_i32 = arith.constant 0 : i32
    %c0_i32_0 = arith.constant 0 : i32
    %c0_i32_1 = arith.constant 0 : i32
    return %c0_i32, %c0_i32_0 : i32, i32
  }
  func.func @transform_6(%arg0: i32) -> (i32, i32) {
    %c0_i32 = arith.constant 0 : i32
    %c0_i32_0 = arith.constant 0 : i32
    %c0_i32_1 = arith.constant 0 : i32
    return %c0_i32, %c0_i32_0 : i32, i32
  }
  func.func @transform_7(%arg0: i32) -> (i32, i32) {
    %c0_i32 = arith.constant 0 : i32
    %c0_i32_0 = arith.constant 0 : i32
    %c0_i32_1 = arith.constant 0 : i32
    return %c0_i32, %c0_i32_0 : i32, i32
  }
  func.func @transform_8(%arg0: i32) -> (i32, i32, i32) {
    %c0_i32 = arith.constant 0 : i32
    %c0_i32_0 = arith.constant 0 : i32
    %c0_i32_1 = arith.constant 0 : i32
    return %arg0, %c0_i32, %c0_i32_0 : i32, i32, i32
  }
}

</mosaic_0001>

<bundles_post_ra>
// kernel: tpu_custom_call.1
= control target key start
LH: loop header
LB: loop body
LE: loop exit
PB: predicated region body
PF: predicated region fallthrough
CT: control target
= control target key end

     0   :  { %13 = vsyncpa [#allocation3], 0  ;;  %s5235_s0 = inlined_call_operand.vmem [shape: f32[2,8,256], index: 0, kind: input, shape index: {}]   ;;  %s5236_s1 = inlined_call_operand.vmem [shape: f32[8,1], index: 1, kind: input, shape index: {}]   ;;  %s5237_s2 = inlined_call_operand.vmem [shape: f32[384,8], index: 2, kind: input, shape index: {}]   ;;  %s5238_s3 = inlined_call_operand.vmem [shape: f32[4,32,4], index: 3, kind: input, shape index: {}]   ;;  %s5239_s4 = inlined_call_operand.vmem [shape: f32[4,32,4], index: 4, kind: input, shape index: {}]   ;;  %s5240_s5 = inlined_call_operand.vmem [shape: f32[8,128], index: 5, kind: input, shape index: {}]   ;;  %s5241_s6 = inlined_call_operand.vmem [shape: f32[8,1], index: 6, kind: input, shape index: {}]   ;;  %s5242_s7 = inlined_call_operand.vmem [shape: f32[8,1], index: 7, kind: input, shape index: {}]   ;;  %s5243_s8 = inlined_call_operand.hbm [shape: f32[2,8,256], index: 8, kind: output, shape index: {}]  }
   0x1   :  { %15 = vsyncpa [#allocation3 + $0x1], 0  ;;  %s3938_s27 = smov 0   ;;  %s3940_s28 = smov 0  }
   0x2   :  { %s3942_s29 = smov 0   ;;  %s3944_s30 = smov 0  }
   0x3 LB: > { %s3959_s9 = sadd.s32 4294967295, %s3885_s30   ;;  %s3354_s10 = sadd.s32 4294967294, %s3885_s30   ;;  %s3885_s30 = sphi %s3944_s30, %s5318_s30   ;;  %s3881_s29 = sphi %s3942_s29, %s5317_s29   ;;  %s3877_s28 = sphi %s3940_s28, %s5316_s28   ;;  %s3873_s27 = sphi %s3938_s27, %s5315_s27  }
   0x4   : > { %s3963_s11 = sadd.s32 1, %s3885_s30   ;;  %s201_s12 = sadd.s32 1, %s3881_s29 }
   0x5   : > { %s198_s13 = ssub.s32 %s3885_s30, %s3963_s11  ;;  %p211_p0 = scmp.ne.s32.totalorder %s3881_s29, %s3877_s28 }
   0x6   : > { %p199_p1 = scmp.eq.s32.totalorder %s198_s13, 0  ;;  %p212_p2 = scmp.eq.s32.totalorder %s3959_s9, 1 }
   0x7   : > { %p217_p3 = scmp.ne.s32.totalorder %s3877_s28, %s3873_s27  ;;  %p218_p4 = scmp.eq.s32.totalorder %s3354_s10, 1 }
   0x8   : > { %s3974_s14 = scalar_select %p199_p1, %s3881_s29, %s201_s12  }
   0x9   : > { %p3976_p5 = por %p212_p2, %p211_p0  ;;  %p3980_p6 = por %p218_p4, %p217_p3 }
   0xa   : > { %p3357_p7 = scmp.ge.s32.totalorder %s3885_s30, 1  ;;  %p265_p8 = scmp.lt.s32.totalorder %s3885_s30, 3 }
   0xc   : > { %p266_p9 = pnand %p3357_p7, %p265_p8 }
   0xe   : > { %269 = sbr.rel (%p266_p9) target bundleno = 2877 (0xb3d), region = 52 }
  0x13   : > { %v340_v0 = vld [vmem:[%s5236_s1] sm:$0xff]  ;;  %v3887_v1 = vmov 0   ;;  %v5244_v2 = vmov 0.0   ;;  %p299_p10 = scmp.lt.s32.totalorder %s3959_s9, 1  ;;  %vm396_vm4 = vcmask 64512   ;;  %v349_v39 = vld [vmem:[%s5237_s2 + $0x8] sm:$0xff] }
  0x14   : > { %3600 = vset.pattern.permute.xlu0 %v3887_v1  ;;  %605 = vmatprep.mubr.f32.mxu0 %v5244_v2  ;;  %v348_v38 = vld [vmem:[%s5237_s2] sm:$0xff]  ;;  %v350_v40 = vld [vmem:[%s5237_s2 + $0x10] sm:$0xff]  ;;  %v351_v41 = vld [vmem:[%s5237_s2 + $0x18] sm:$0xff]  ;;  %vm1011_vm5 = vcmask 31744   ;;  %s3889_s25 = smov 96   ;;  %vm1326_vm6 = vcmask 261120  }
  0x15   : > { %343 = vperm.xlu0 %3600, %v340_v0   ;;  %s300_s19 = scalar_select %p299_p10, %s3959_s9, 1  ;;  %v352_v42 = vld [vmem:[%s5237_s2 + $0x20] sm:$0xff]  ;;  %v353_v43 = vld [vmem:[%s5237_s2 + $0x28] sm:$0xff]  ;;  %v354_v44 = vld [vmem:[%s5237_s2 + $0x30] sm:$0xff] }
  0x16   : > { %v355_v45 = vld [vmem:[%s5237_s2 + $0x38] sm:$0xff]  ;;  %v356_v46 = vld [vmem:[%s5237_s2 + $0x40] sm:$0xff]  ;;  %v357_v47 = vld [vmem:[%s5237_s2 + $0x48] sm:$0xff]  ;;  %s296_s24 = sand.u32 1, %s3877_s28   ;;  %s3467_s26 = sshll.u32 %s3959_s9, 8 }
  0x17   : > { %s3466_s20 = sshll.u32 %s300_s19, 4  ;;  %v358_v48 = vld [vmem:[%s5237_s2 + $0x50] sm:$0xff]  ;;  %v359_v49 = vld [vmem:[%s5237_s2 + $0x58] sm:$0xff]  ;;  %v360_v50 = vld [vmem:[%s5237_s2 + $0x60] sm:$0xff]  ;;  %s3891_s19 = smov 32  }
  0x18   : > { %s303_s23 = scalar_lea.vmem %s5235_s0, %s3466_s20  ;;  %v361_v51 = vld [vmem:[%s5237_s2 + $0x68] sm:$0xff]  ;;  %v362_v52 = vld [vmem:[%s5237_s2 + $0x70] sm:$0xff]  ;;  %v363_v53 = vld [vmem:[%s5237_s2 + $0x78] sm:$0xff]  ;;  %s3293_s18 = scalar_lea.hbm %s5243_s8, %s3467_s26 }
  0x19   : > { %v305_v3 = vld [vmem:[%s303_s23 + $0x8] sm:$0xff]  ;;  %v304_v4 = vld [vmem:[%s303_s23] sm:$0xff]  ;;  %v366_v56 = vld [vmem:[%s5237_s2 + $0x90] sm:$0xff]  ;;  %s3890_s23 = smov 64   ;;  %s3892_s21 = smov [#allocation2]  }
  0x1a   : > { %v307_v5 = vmul.f32 %v305_v3, %v305_v3  ;;  %v306_v6 = vmul.f32 %v304_v4, %v304_v4  ;;  %v364_v54 = vld [vmem:[%s5237_s2 + $0x80] sm:$0xff]  ;;  %v365_v55 = vld [vmem:[%s5237_s2 + $0x88] sm:$0xff]  ;;  %v367_v57 = vld [vmem:[%s5237_s2 + $0x98] sm:$0xff]  ;;  %s3829_s22 = sshll.u32 %s3892_s21, 4  ;;  %s3830_s22 = int_to_ptr.vmem [resolvable:$false] %s3829_s22 }
  0x1b   : > { %v368_v58 = vld [vmem:[%s5237_s2 + $0xa0] sm:$0xff]  ;;  %v369_v59 = vld [vmem:[%s5237_s2 + $0xa8] sm:$0xff]  ;;  %v370_v60 = vld [vmem:[%s5237_s2 + $0xb0] sm:$0xff]  ;;  %s3831_s9 = scalar_lea.vmem %s3830_s22, 512 }
  0x1c   : > { %v314_v7 = vrot.slane %v307_v5, 4  ;;  %v308_v8 = vrot.slane %v306_v6, 4  ;;  %v371_v61 = vld [vmem:[%s5237_s2 + $0xb8] sm:$0xff]  ;;  %v372_v62 = vld [vmem:[%s5237_s2 + $0xc0] sm:$0xff]  ;;  %v373_v63 = vld [vmem:[%s5237_s2 + $0xc8] sm:$0xff] }
  0x1d   : > { %v374_v0 = vld [vmem:[%s5237_s2 + $0xd0] sm:$0xff]  ;;  %v375_v1 = vld [vmem:[%s5237_s2 + $0xd8] sm:$0xff] }
  0x1e   : > { %v315_v9 = vadd.f32 %v314_v7, %v307_v5  ;;  %v309_v10 = vadd.f32 %v308_v8, %v306_v6  ;;  %v378_v5 = vld [vmem:[%s5237_s2 + $0xf0] sm:$0xff]  ;;  %v379_v6 = vld [vmem:[%s5237_s2 + $0xf8] sm:$0xff]  ;;  %v380_v7 = vld [vmem:[%s5237_s2 + $0x100] sm:$0xff] }
  0x1f   : > { %v381_v8 = vld [vmem:[%s5237_s2 + $0x108] sm:$0xff] }
  0x20   : > { %v316_v11 = vrot.slane %v315_v9, 2  ;;  %v310_v12 = vrot.slane %v309_v10, 2 }
  0x22   : > { %v317_v13 = vadd.f32 %v316_v11, %v315_v9  ;;  %v311_v14 = vadd.f32 %v310_v12, %v309_v10  ;;  %v4167_v9 = vld [vmem:[%s5238_s3] sm:$0xff]  ;;  %v382_v10 = vld [vmem:[%s5237_s2 + $0x110] sm:$0xff]  ;;  %v4179_v12 = vld [vmem:[%s5238_s3 + $0x8] sm:$0xff] }
  0x23   : > { %v1012_v11 = vsel %vm1011_vm5, %v4167_v9, -inf }
  0x24   : > { %v318_v15 = vrot.slane %v317_v13, 1  ;;  %v312_v16 = vrot.slane %v311_v14, 1  ;;  %1013 = vmax.xlane.f32.xlu1 %v1012_v11 }
  0x26   : > { %v319_v17 = vadd.f32 %v318_v15, %v317_v13  ;;  %v313_v18 = vadd.f32 %v312_v16, %v311_v14  ;;  %v383_v13 = vld [vmem:[%s5237_s2 + $0x118] sm:$0xff]  ;;  %v1015_v14 = vsel %vm1011_vm5, %v4179_v12, -inf  ;;  %v4191_v15 = vld [vmem:[%s5238_s3 + $0x10] sm:$0xff] }
  0x27   : > { %v1018_v16 = vsel %vm1011_vm5, %v4191_v15, -inf }
  0x28   : > { %3601 = vrsqrt.f32 %v319_v17  ;;  %vm329_vm0 = vcmp.eq.f32.partialorder %v319_v17, inf  ;;  %vm322_vm1 = vcmp.eq.f32.partialorder %v313_v18, inf  ;;  %v332_v23 = vand.u32 2147483648, %v319_v17  ;;  %1016 = vmax.xlane.f32.xlu1 %v1015_v14 }
  0x29   : > { %3603 = vrsqrt.f32 %v313_v18  ;;  %vm331_vm2 = vcmp.eq.f32.partialorder %v319_v17, 0.0  ;;  %v325_v25 = vand.u32 2147483648, %v313_v18  ;;  %vm324_vm3 = vcmp.eq.f32.partialorder %v313_v18, 0.0 }
  0x2c   : > { %1019 = vmax.xlane.f32.xlu1 %v1018_v16 }
  0x35   : > { %v3602_v19 = vpop.eup %3601 }
  0x36   : > { %v3604_v20 = vpop.eup %3603  ;;  %v328_v21 = vmul.f32 %v3602_v19, %v319_v17  ;;  %v924_v19 = vld [vmem:[%s5239_s4 + $0x68] sm:$0xff] }
  0x37   : > { %v321_v22 = vmul.f32 %v3604_v20, %v313_v18  ;;  %v923_v20 = vld [vmem:[%s5239_s4 + $0x60] sm:$0xff] }
  0x38   : > { %v330_v24 = vsel %vm329_vm0, %v319_v17, %v328_v21  ;;  %v926_v17 = vld [vmem:[%s5239_s4 + $0x78] sm:$0xff] }
  0x39   : > { %v323_v26 = vsel %vm322_vm1, %v313_v18, %v321_v22  ;;  %v333_v27 = vsel %vm331_vm2, %v332_v23, %v330_v24  ;;  %v925_v18 = vld [vmem:[%s5239_s4 + $0x70] sm:$0xff] }
  0x3a   : > { %v326_v28 = vsel %vm324_vm3, %v325_v25, %v323_v26  ;;  %v335_v29 = vmax.f32 %v333_v27, 1e-12 }
  0x3b   : > { %v334_v30 = vmax.f32 %v326_v28, 1e-12 }
  0x3c   : > { %3605 = vrcp.f32 %v335_v29 }
  0x3d   : > { %3607 = vrcp.f32 %v334_v30 }
  0x49   : > { %v3606_v31 = vpop.eup %3605 }
  0x4a   : > { %v3608_v32 = vpop.eup %3607  ;;  %v339_v33 = vmul.f32 %v3606_v31, %v305_v3  ;;  %v376_v3 = vld [vmem:[%s5237_s2 + $0xe0] sm:$0xff] }
  0x4b   : > { %v338_v34 = vmul.f32 %v3608_v32, %v304_v4  ;;  %v377_v4 = vld [vmem:[%s5237_s2 + $0xe8] sm:$0xff] }
  0x90   : > { %v344_v35 = vpop.permute.xlu0 %343 }
  0x91   : > { %v347_v36 = vmul.f32 %v344_v35, %v339_v33  ;;  %v346_v37 = vmul.f32 %v344_v35, %v338_v34 }
  0x93   : > { %571 = vmatprep.subr.mxu0 %v347_v36 }
  0x94   : > { %572 = vmatpush1.msra.mxu0 %v346_v37 }
  0x95   : > { %3361 = vmatmul.mubr.msk.f32.vlgmr.msra.gmra.mxu0 %vm396_vm4, %v348_v38  ;;  %3542 = vmatprep.subr.msk.mxu0 %vm1011_vm5, %v926_v17 }
  0x96   : > { %611 = vmatprep.mubr.f32.mxu0 %v5244_v2  ;;  %3543 = vmatpush3.xpose.msk.msra.mxu0 %vm1011_vm5, %v926_v17 }
  0x97   : > { %3544 = vmatprep.subr.msk.mxu0 %vm1011_vm5, %v925_v18 }
  0x99   : > { %3362 = vmatmul.mubr.msk.f32.gmra.mxu0 %vm396_vm4, %v349_v39 }
  0x9a   : > { %617 = vmatprep.mubr.f32.mxu0 %v5244_v2  ;;  %3545 = vmatpush3.xpose.msk.msra.mxu0 %vm1011_vm5, %v925_v18 }
  0x9b   : > { %3546 = vmatprep.subr.msk.mxu0 %vm1011_vm5, %v924_v19 }
  0x9d   : > { %3363 = vmatmul.mubr.msk.f32.gmra.mxu0 %vm396_vm4, %v350_v40 }
  0x9e   : > { %623 = vmatprep.mubr.f32.mxu0 %v5244_v2  ;;  %3547 = vmatpush3.xpose.msk.msra.mxu0 %vm1011_vm5, %v924_v19 }
  0x9f   : > { %3548 = vmatprep.subr.msk.mxu0 %vm1011_vm5, %v923_v20 }
  0xa1   : > { %3364 = vmatmul.mubr.msk.f32.gmra.mxu0 %vm396_vm4, %v351_v41 }
  0xa2   : > { %629 = vmatprep.mubr.f32.mxu0 %v5244_v2  ;;  %3549 = vmatpush3.xpose.msk.msra.mxu0 %vm1011_vm5, %v923_v20 }
  0xa5   : > { %3365 = vmatmul.mubr.msk.f32.gmra.mxu0 %vm396_vm4, %v352_v42 }
  0xa6   : > { %635 = vmatprep.mubr.f32.mxu0 %v5244_v2 }
  0xa9   : > { %3366 = vmatmul.mubr.msk.f32.gmra.mxu0 %vm396_vm4, %v353_v43 }
  0xaa   : > { %641 = vmatprep.mubr.f32.mxu0 %v5244_v2 }
  0xad   : > { %3367 = vmatmul.mubr.msk.f32.gmra.mxu0 %vm396_vm4, %v354_v44 }
  0xae   : > { %647 = vmatprep.mubr.f32.mxu0 %v5244_v2 }
  0xb1   : > { %3368 = vmatmul.mubr.msk.f32.gmra.mxu0 %vm396_vm4, %v355_v45 }
  0xb2   : > { %653 = vmatprep.mubr.f32.mxu0 %v5244_v2 }
  0xb5   : > { %3369 = vmatmul.mubr.msk.f32.gmra.mxu0 %vm396_vm4, %v356_v46 }
  0xb6   : > { %659 = vmatprep.mubr.f32.mxu0 %v5244_v2 }
  0xb9   : > { %3370 = vmatmul.mubr.msk.f32.gmra.mxu0 %vm396_vm4, %v357_v47 }
  0xba   : > { %665 = vmatprep.mubr.f32.mxu0 %v5244_v2 }
  0xbd   : > { %3371 = vmatmul.mubr.msk.f32.gmra.mxu0 %vm396_vm4, %v358_v48 }
  0xbe   : > { %671 = vmatprep.mubr.f32.mxu0 %v5244_v2 }
  0xc1   : > { %3372 = vmatmul.mubr.msk.f32.gmra.mxu0 %vm396_vm4, %v359_v49 }
  0xc2   : > { %677 = vmatprep.mubr.f32.mxu0 %v5244_v2 }
  0xc5   : > { %3373 = vmatmul.mubr.msk.f32.gmra.mxu0 %vm396_vm4, %v360_v50 }
  0xc6   : > { %683 = vmatprep.mubr.f32.mxu0 %v5244_v2 }
  0xc9   : > { %3374 = vmatmul.mubr.msk.f32.gmra.mxu0 %vm396_vm4, %v361_v51 }
  0xca   : > { %689 = vmatprep.mubr.f32.mxu0 %v5244_v2 }
  0xcd   : > { %3375 = vmatmul.mubr.msk.f32.gmra.mxu0 %vm396_vm4, %v362_v52 }
  0xce   : > { %695 = vmatprep.mubr.f32.mxu0 %v5244_v2 }
  0xd1   : > { %3376 = vmatmul.mubr.msk.f32.gmra.mxu0 %vm396_vm4, %v363_v53 }
  0xd2   : > { %701 = vmatprep.mubr.f32.mxu0 %v5244_v2 }
  0xd5   : > { %3377 = vmatmul.mubr.msk.f32.gmra.mxu0 %vm396_vm4, %v364_v54 }
  0xd6   : > { %707 = vmatprep.mubr.f32.mxu0 %v5244_v2 }
  0xd9   : > { %3378 = vmatmul.mubr.msk.f32.gmra.mxu0 %vm396_vm4, %v365_v55 }
  0xda   : > { %713 = vmatprep.mubr.f32.mxu0 %v5244_v2 }
  0xdd   : > { %3379 = vmatmul.mubr.msk.f32.gmra.mxu0 %vm396_vm4, %v366_v56 }
  0xde   : > { %719 = vmatprep.mubr.f32.mxu0 %v5244_v2 }
  0xe1   : > { %3380 = vmatmul.mubr.msk.f32.gmra.mxu0 %vm396_vm4, %v367_v57 }
  0xe2   : > { %725 = vmatprep.mubr.f32.mxu0 %v5244_v2 }
  0xe5   : > { %3381 = vmatmul.mubr.msk.f32.gmra.mxu0 %vm396_vm4, %v368_v58 }
  0xe6   : > { %731 = vmatprep.mubr.f32.mxu0 %v5244_v2 }
  0xe9   : > { %3382 = vmatmul.mubr.msk.f32.gmra.mxu0 %vm396_vm4, %v369_v59 }
  0xea   : > { %737 = vmatprep.mubr.f32.mxu0 %v5244_v2 }
  0xed   : > { %3383 = vmatmul.mubr.msk.f32.gmra.mxu0 %vm396_vm4, %v370_v60 }
  0xee   : > { %743 = vmatprep.mubr.f32.mxu0 %v5244_v2 }
  0xf1   : > { %3384 = vmatmul.mubr.msk.f32.gmra.mxu0 %vm396_vm4, %v371_v61 }
  0xf2   : > { %749 = vmatprep.mubr.f32.mxu0 %v5244_v2 }
  0xf5   : > { %3385 = vmatmul.mubr.msk.f32.gmra.mxu0 %vm396_vm4, %v372_v62 }
  0xf6   : > { %755 = vmatprep.mubr.f32.mxu0 %v5244_v2 }
  0xf9   : > { %3386 = vmatmul.mubr.msk.f32.gmra.mxu0 %vm396_vm4, %v373_v63 }
  0xfa   : > { %761 = vmatprep.mubr.f32.mxu0 %v5244_v2 }
  0xfd   : > { %3387 = vmatmul.mubr.msk.f32.gmra.mxu0 %vm396_vm4, %v374_v0 }
  0xfe   : > { %767 = vmatprep.mubr.f32.mxu0 %v5244_v2 }
 0x101   : > { %3388 = vmatmul.mubr.msk.f32.gmra.mxu0 %vm396_vm4, %v375_v1 }
 0x102   : > { %773 = vmatprep.mubr.f32.mxu0 %v5244_v2 }
 0x105   : > { %3389 = vmatmul.mubr.msk.f32.gmra.mxu0 %vm396_vm4, %v376_v3 }
 0x106   : > { %779 = vmatprep.mubr.f32.mxu0 %v5244_v2 }
 0x109   : > { %3390 = vmatmul.mubr.msk.f32.gmra.mxu0 %vm396_vm4, %v377_v4 }
 0x10a   : > { %785 = vmatprep.mubr.f32.mxu0 %v5244_v2 }
 0x10d   : > { %3391 = vmatmul.mubr.msk.f32.gmra.mxu0 %vm396_vm4, %v378_v5 }
 0x10e   : > { %791 = vmatprep.mubr.f32.mxu0 %v5244_v2 }
 0x111   : > { %3392 = vmatmul.mubr.msk.f32.gmra.mxu0 %vm396_vm4, %v379_v6 }
 0x112   : > { %797 = vmatprep.mubr.f32.mxu0 %v5244_v2 }
 0x115   : > { %3393 = vmatmul.mubr.msk.f32.gmra.mxu0 %vm396_vm4, %v380_v7 }
 0x116   : > { %803 = vmatprep.mubr.f32.mxu0 %v5244_v2 }
 0x119   : > { %3394 = vmatmul.mubr.msk.f32.gmra.mxu0 %vm396_vm4, %v381_v8 }
 0x11a   : > { %809 = vmatprep.mubr.f32.mxu0 %v5244_v2 }
 0x11d   : > { %3395 = vmatmul.mubr.msk.f32.gmra.mxu0 %vm396_vm4, %v382_v10 }
 0x11e   : > { %815 = vmatprep.mubr.f32.mxu0 %v5244_v2 }
 0x121   : > { %3396 = vmatmul.mubr.msk.f32.gmra.mxu0 %vm396_vm4, %v383_v13 }
 0x122   : > { %821 = vmatprep.mubr.f32.mxu0 %v5244_v2 }
 0x155   : > { %v607_v21 = vpop.f32.mrf.mxu0 }
 0x157   : > { %v609_v22 = vpop.f32.mrf.mxu0 }
 0x159   : > { %v613_v23 = vpop.f32.mrf.mxu0 }
 0x15b   : > { %v615_v24 = vpop.f32.mrf.mxu0 }
 0x15d   : > { %v619_v25 = vpop.f32.mrf.mxu0 }
 0x15e   : > { %v927_v26 = vmax.f32 %v607_v21, %v619_v25 }
 0x15f   : > { %v621_v27 = vpop.f32.mrf.mxu0 }
 0x160   : > { %v936_v28 = vmax.f32 %v609_v22, %v621_v27 }
 0x161   : > { %v625_v29 = vpop.f32.mrf.mxu0 }
 0x162   : > { %v928_v30 = vmax.f32 %v613_v23, %v625_v29 }
 0x163   : > { %v627_v31 = vpop.f32.mrf.mxu0 }
 0x164   : > { %v929_v32 = vmax.f32 %v927_v26, %v928_v30  ;;  %v937_v33 = vmax.f32 %v615_v24, %v627_v31 }
 0x165   : > { %v4216_v34 = vpop.f32.mrf.mxu0 }
 0x166   : > { %v930_v35 = vrot.slane %v929_v32, 4  ;;  %v938_v36 = vmax.f32 %v936_v28, %v937_v33 }
 0x167   : > { %v4218_v37 = vpop.f32.mrf.mxu0 }
 0x168   : > { %v931_v38 = vmax.f32 %v929_v32, %v930_v35  ;;  %v939_v39 = vrot.slane %v938_v36, 4 }
 0x169   : > { %v4220_v40 = vpop.f32.mrf.mxu0 }
 0x16a   : > { %v932_v41 = vrot.slane %v931_v38, 2  ;;  %v940_v42 = vmax.f32 %v938_v36, %v939_v39 }
 0x16b   : > { %v4222_v43 = vpop.f32.mrf.mxu0 }
 0x16c   : > { %v933_v44 = vmax.f32 %v931_v38, %v932_v41  ;;  %v941_v45 = vrot.slane %v940_v42, 2 }
 0x16d   : > { %v4224_v46 = vpop.f32.mrf.mxu0 }
 0x16e   : > { %v934_v47 = vrot.slane %v933_v44, 1  ;;  %v942_v48 = vmax.f32 %v940_v42, %v941_v45  ;;  %v1428_v49 = vmax.f32 %v4216_v34, %v4224_v46 }
 0x16f   : > { %v4228_v50 = vpop.f32.mrf.mxu0 }
 0x170   : > { %v935_v51 = vmax.f32 %v933_v44, %v934_v47  ;;  %v943_v52 = vrot.slane %v942_v48, 1  ;;  %v1437_v53 = vmax.f32 %v4218_v37, %v4228_v50 }
 0x171   : > { %v4232_v54 = vpop.f32.mrf.mxu0 }
 0x172   : > { %v945_v55 = vsub.f32 %v607_v21, %v935_v51  ;;  %v947_v56 = vsub.f32 %v613_v23, %v935_v51  ;;  %v949_v57 = vsub.f32 %v619_v25, %v935_v51  ;;  %v951_v58 = vsub.f32 %v625_v29, %v935_v51 }
 0x173   : > { %v944_v59 = vmax.f32 %v942_v48, %v943_v52  ;;  %v1429_v60 = vmax.f32 %v4220_v40, %v4232_v54  ;;  %v4236_v61 = vpop.f32.mrf.mxu0 }
 0x174   : > { %v953_v62 = vmul.f32 1.442695, %v945_v55  ;;  %v957_v63 = vmul.f32 1.442695, %v947_v56  ;;  %v961_v0 = vmul.f32 1.442695, %v949_v57  ;;  %v1438_v1 = vmax.f32 %v4222_v43, %v4236_v61 }
 0x175   : > { %v965_v3 = vmul.f32 1.442695, %v951_v58  ;;  %v946_v4 = vsub.f32 %v609_v22, %v944_v59  ;;  %v948_v5 = vsub.f32 %v615_v24, %v944_v59  ;;  %v950_v6 = vsub.f32 %v621_v27, %v944_v59  ;;  %v4240_v7 = vpop.f32.mrf.mxu0 }
 0x176   : > { %3609 = vpow2.f32 %v953_v62  ;;  %v952_v8 = vsub.f32 %v627_v31, %v944_v59  ;;  %v1430_v10 = vmax.f32 %v1428_v49, %v1429_v60  ;;  %v1439_v11 = vmax.f32 %v1437_v53, %v1438_v1 }
 0x177   : > { %3611 = vpow2.f32 %v957_v63  ;;  %v955_v13 = vmul.f32 1.442695, %v946_v4  ;;  %v959_v14 = vmul.f32 1.442695, %v948_v5  ;;  %v4242_v16 = vpop.f32.mrf.mxu0  ;;  %v963_v19 = vmul.f32 1.442695, %v950_v6 }
 0x178   : > { %3613 = vpow2.f32 %v961_v0  ;;  %v1431_v17 = vrot.slane %v1430_v10, 4  ;;  %v1440_v18 = vrot.slane %v1439_v11, 4  ;;  %v967_v23 = vmul.f32 1.442695, %v952_v8 }
 0x179   : > { %3615 = vpow2.f32 %v965_v3  ;;  %v4244_v20 = vpop.f32.mrf.mxu0 }
 0x17a   : > { %3617 = vpow2.f32 %v955_v13  ;;  %v1432_v21 = vmax.f32 %v1430_v10, %v1431_v17  ;;  %v1441_v22 = vmax.f32 %v1439_v11, %v1440_v18 }
 0x17b   : > { %3619 = vpow2.f32 %v959_v14  ;;  %v4246_v24 = vpop.f32.mrf.mxu0 }
 0x17c   : > { %v1433_v25 = vrot.slane %v1432_v21, 2  ;;  %v1442_v26 = vrot.slane %v1441_v22, 2  ;;  %3621 = vpow2.f32 %v963_v19 }
 0x17d   : > { %v4248_v27 = vpop.f32.mrf.mxu0  ;;  %3623 = vpow2.f32 %v967_v23 }
 0x17e   : > { %v1434_v28 = vmax.f32 %v1432_v21, %v1433_v25  ;;  %v1443_v29 = vmax.f32 %v1441_v22, %v1442_v26  ;;  %v2076_v30 = vmax.f32 %v4240_v7, %v4248_v27 }
 0x17f   : > { %v4252_v31 = vpop.f32.mrf.mxu0 }
 0x180   : > { %v1435_v32 = vrot.slane %v1434_v28, 1  ;;  %v1444_v33 = vrot.slane %v1443_v29, 1  ;;  %v2085_v35 = vmax.f32 %v4242_v16, %v4252_v31 }
 0x181   : > { %v4256_v36 = vpop.f32.mrf.mxu0 }
 0x182   : > { %v1436_v38 = vmax.f32 %v1434_v28, %v1435_v32  ;;  %v1445_v39 = vmax.f32 %v1443_v29, %v1444_v33  ;;  %v2077_v41 = vmax.f32 %v4244_v20, %v4256_v36 }
 0x183   : > { %v4260_v42 = vpop.eup %3609  ;;  %v4262_v44 = vpop.f32.mrf.mxu0 }
 0x184   : > { %v4264_v45 = vpop.eup %3611  ;;  %v1446_v47 = vsub.f32 %v4216_v34, %v1436_v38  ;;  %v1448_v48 = vsub.f32 %v4220_v40, %v1436_v38  ;;  %v1450_v49 = vsub.f32 %v4224_v46, %v1436_v38  ;;  %v1452_v51 = vsub.f32 %v4232_v54, %v1436_v38 }
 0x185   : > { %v4270_v52 = vpop.eup %3613  ;;  %v969_v53 = vadd.f32 %v4264_v45, %v4260_v42  ;;  %v1447_v55 = vsub.f32 %v4218_v37, %v1445_v39  ;;  %v1449_v56 = vsub.f32 %v4222_v43, %v1445_v39  ;;  %v1451_v57 = vsub.f32 %v4228_v50, %v1445_v39  ;;  %v4277_v58 = vpop.f32.mrf.mxu0 }
 0x186   : > { %v4279_v34 = vpop.eup %3615  ;;  %v1454_v40 = vmul.f32 1.442695, %v1446_v47  ;;  %v1458_v59 = vmul.f32 1.442695, %v1448_v48  ;;  %v1462_v46 = vmul.f32 1.442695, %v1450_v49  ;;  %v1453_v54 = vsub.f32 %v4236_v61, %v1445_v39 }
 0x187   : > { %v4282_v60 = vpop.eup %3617  ;;  %v970_v62 = vadd.f32 %v4270_v52, %v969_v53  ;;  %v1466_v63 = vmul.f32 1.442695, %v1452_v51  ;;  %v4285_v0 = vpop.f32.mrf.mxu0  ;;  %v1456_v43 = vmul.f32 1.442695, %v1447_v55  ;;  %v1460_v50 = vmul.f32 1.442695, %v1449_v56 }
 0x188   : > { %v4287_v37 = vpop.eup %3619  ;;  %3625 = vpow2.f32 %v1454_v40  ;;  %v2078_v1 = vmax.f32 %v2076_v30, %v2077_v41  ;;  %v2086_v61 = vmax.f32 %v4246_v24, %v4262_v44  ;;  %v1464_v8 = vmul.f32 1.442695, %v1451_v57 }
 0x189   : > { %v971_v3 = vadd.f32 %v4279_v34, %v970_v62  ;;  %v978_v4 = vadd.f32 %v4287_v37, %v4282_v60  ;;  %3627 = vpow2.f32 %v1458_v59  ;;  %v4294_v5 = vpop.f32.mrf.mxu0  ;;  %v4296_v6 = vpop.eup %3621  ;;  %v1468_v19 = vmul.f32 1.442695, %v1453_v54 }
 0x18a   : > { %3629 = vpow2.f32 %v1462_v46  ;;  %v2079_v10 = vrot.slane %v2078_v1, 4  ;;  %v2087_v14 = vmax.f32 %v2085_v35, %v2086_v61  ;;  %v4301_v18 = vpop.eup %3623 }
 0x18b   : > { %v972_v11 = vrot.slane %v971_v3, 4  ;;  %v979_v13 = vadd.f32 %v4296_v6, %v978_v4  ;;  %3631 = vpow2.f32 %v1466_v63  ;;  %v4299_v17 = vpop.f32.mrf.mxu0 }
 0x18c   : > { %3633 = vpow2.f32 %v1456_v43  ;;  %v2080_v21 = vmax.f32 %v2078_v1, %v2079_v10  ;;  %v2088_v25 = vrot.slane %v2087_v14, 4 }
 0x18d   : > { %v973_v22 = vadd.f32 %v972_v11, %v971_v3  ;;  %v980_v23 = vadd.f32 %v4301_v18, %v979_v13  ;;  %3635 = vpow2.f32 %v1460_v50  ;;  %v4304_v26 = vpop.f32.mrf.mxu0 }
 0x18e   : > { %v2081_v28 = vrot.slane %v2080_v21, 2  ;;  %v2652_v29 = vmax.f32 %v4277_v58, %v4304_v26  ;;  %3637 = vpow2.f32 %v1464_v8  ;;  %v2089_v33 = vmax.f32 %v2087_v14, %v2088_v25 }
 0x18f   : > { %v974_v30 = vrot.slane %v973_v22, 2  ;;  %v981_v32 = vrot.slane %v980_v23, 4  ;;  %v4308_v35 = vpop.f32.mrf.mxu0  ;;  %3639 = vpow2.f32 %v1468_v19 }
 0x190   : > { %v2082_v38 = vmax.f32 %v2080_v21, %v2081_v28  ;;  %v2090_v47 = vrot.slane %v2089_v33, 2  ;;  %v2661_v63 = vmax.f32 %v4285_v0, %v4308_v35 }
 0x191   : > { %v975_v39 = vadd.f32 %v974_v30, %v973_v22  ;;  %v982_v41 = vadd.f32 %v981_v32, %v980_v23  ;;  %v4310_v48 = vpop.f32.mrf.mxu0 }
 0x192   : > { %v2083_v49 = vrot.slane %v2082_v38, 1  ;;  %v2653_v51 = vmax.f32 %v4294_v5, %v4310_v48  ;;  %v2091_v53 = vmax.f32 %v2089_v33, %v2090_v47 }
 0x193   : > { %v4314_v55 = vpop.f32.mrf.mxu0  ;;  %v983_v56 = vrot.slane %v982_v41, 2  ;;  %v976_v57 = vrot.slane %v975_v39, 1 }
 0x194   : > { %v2084_v40 = vmax.f32 %v2082_v38, %v2083_v49  ;;  %v2654_v59 = vmax.f32 %v2652_v29, %v2653_v51  ;;  %v2662_v46 = vmax.f32 %v4299_v17, %v4314_v55  ;;  %v2092_v62 = vrot.slane %v2091_v53, 1 }
 0x195   : > { %v4318_v54 = vpop.eup %3625  ;;  %v4322_v43 = vpop.f32.mrf.mxu0  ;;  %v984_v50 = vadd.f32 %v983_v56, %v982_v41  ;;  %v4324_v1 = vadd.f32 %v976_v57, %v975_v39 }
 0x196   : > { %v4326_v3 = vpop.eup %3627  ;;  %v2094_v4 = vsub.f32 %v4240_v7, %v2084_v40  ;;  %v2096_v61 = vsub.f32 %v4244_v20, %v2084_v40  ;;  %v2098_v8 = vsub.f32 %v4248_v27, %v2084_v40  ;;  %v2100_v10 = vsub.f32 %v4256_v36, %v2084_v40 }
 0x197   : > { %v4332_v11 = vpop.eup %3629  ;;  %v1470_v13 = vadd.f32 %v4326_v3, %v4318_v54  ;;  %v2093_v14 = vmax.f32 %v2091_v53, %v2092_v62  ;;  %v2655_v19 = vrot.slane %v2654_v59, 4  ;;  %v2663_v21 = vmax.f32 %v2661_v63, %v2662_v46  ;;  %v4336_v22 = vpop.f32.mrf.mxu0 }
 0x198   : > { %v4338_v23 = vpop.eup %3631  ;;  %v2102_v25 = vmul.f32 1.442695, %v2094_v4  ;;  %v2106_v7 = vmul.f32 1.442695, %v2096_v61  ;;  %v2110_v28 = vmul.f32 1.442695, %v2098_v8  ;;  %v999_v20 = vmax.f32 %v4322_v43, %v4336_v22 }
 0x199   : > { %v4342_v27 = vpop.eup %3633  ;;  %v1471_v36 = vadd.f32 %v4332_v11, %v1470_v13  ;;  %v2114_v29 = vmul.f32 1.442695, %v2100_v10  ;;  %v2095_v30 = vsub.f32 %v4242_v16, %v2093_v14  ;;  %v2097_v32 = vsub.f32 %v4246_v24, %v2093_v14  ;;  %v4347_v33 = vpop.f32.mrf.mxu0 }
 0x19a   : > { %v4349_v38 = vpop.eup %3635  ;;  %3641 = vpow2.f32 %v2102_v25  ;;  %v2099_v39 = vsub.f32 %v4252_v31, %v2093_v14  ;;  %v2101_v41 = vsub.f32 %v4262_v44, %v2093_v14  ;;  %v2656_v47 = vmax.f32 %v2654_v59, %v2655_v19  ;;  %1000 = vmax.xlane.f32.xlu0 %v999_v20 }
 0x19b   : > { %v1472_v49 = vadd.f32 %v4338_v23, %v1471_v36  ;;  %v1479_v51 = vadd.f32 %v4349_v38, %v4342_v27  ;;  %3643 = vpow2.f32 %v2106_v7  ;;  %v2104_v16 = vmul.f32 1.442695, %v2095_v30  ;;  %v4356_v53 = vpop.f32.mrf.mxu0  ;;  %v4358_v24 = vpop.eup %3637 }
 0x19c   : > { %3645 = vpow2.f32 %v2110_v28  ;;  %v2108_v56 = vmul.f32 1.442695, %v2097_v32  ;;  %v2112_v57 = vmul.f32 1.442695, %v2099_v39  ;;  %v2116_v40 = vmul.f32 1.442695, %v2101_v41  ;;  %v4363_v62 = vpop.eup %3639 }
 0x19d   : > { %v1473_v31 = vrot.slane %v1472_v49, 4  ;;  %v1480_v44 = vadd.f32 %v4358_v24, %v1479_v51  ;;  %3647 = vpow2.f32 %v2114_v29  ;;  %v2657_v59 = vrot.slane %v2656_v47, 2  ;;  %v4361_v46 = vpop.f32.mrf.mxu0 }
 0x19e   : > { %3649 = vpow2.f32 %v2104_v16  ;;  %v2664_v63 = vrot.slane %v2663_v21, 4  ;;  %v1002_v4 = vmax.f32 %v4347_v33, %v4356_v53  ;;  %v985_v61 = vrot.slane %v984_v50, 1 }
 0x19f   : > { %v1474_v8 = vadd.f32 %v1473_v31, %v1472_v49  ;;  %v1481_v10 = vadd.f32 %v4363_v62, %v1480_v44  ;;  %3651 = vpow2.f32 %v2108_v56  ;;  %v2658_v13 = vmax.f32 %v2656_v47, %v2657_v59  ;;  %v4368_v14 = vpop.f32.mrf.mxu0 }
 0x1a0   : > { %3653 = vpow2.f32 %v2112_v57  ;;  %v2665_v19 = vmax.f32 %v2663_v21, %v2664_v63  ;;  %1003 = vmax.xlane.f32.xlu1 %v1002_v4  ;;  %v1005_v25 = vmax.f32 %v4361_v46, %v4368_v14  ;;  %v986_v7 = vadd.f32 %v985_v61, %v984_v50 }
 0x1a1   : > { %v1482_v28 = vrot.slane %v1481_v10, 4  ;;  %3655 = vpow2.f32 %v2116_v40  ;;  %v2659_v20 = vrot.slane %v2658_v13, 1  ;;  %v4372_v36 = vpop.f32.mrf.mxu0  ;;  %v1475_v30 = vrot.slane %v1474_v8, 2 }
 0x1a2   : > { %v2666_v29 = vrot.slane %v2665_v19, 2  ;;  %3657 = vrcp.f32 %v986_v7 }
 0x1a3   : > { %v1483_v32 = vadd.f32 %v1482_v28, %v1481_v10  ;;  %v2660_v39 = vmax.f32 %v2658_v13, %v2659_v20  ;;  %v4374_v41 = vpop.f32.mrf.mxu0  ;;  %3659 = vrcp.f32 %v4324_v1  ;;  %v4388_v1 = vld [vmem:[%s5238_s3 + $0x18] sm:$0xff]  ;;  %v1476_v44 = vadd.f32 %v1475_v30, %v1474_v8 }
 0x1a4   : > { %v2667_v21 = vmax.f32 %v2665_v19, %v2666_v29  ;;  %1006 = vmax.xlane.f32.xlu1 %v1005_v25  ;;  %v1008_v47 = vmax.f32 %v4372_v36, %v4374_v41  ;;  %v1021_v8 = vsel %vm1011_vm5, %v4388_v1, -inf }
 0x1a5   : > { %v2670_v50 = vsub.f32 %v4277_v58, %v2660_v39  ;;  %v2672_v49 = vsub.f32 %v4294_v5, %v2660_v39  ;;  %v2674_v51 = vsub.f32 %v4304_v26, %v2660_v39  ;;  %v2676_v16 = vsub.f32 %v4310_v48, %v2660_v39  ;;  %v4383_v56 = vpop.f32.mrf.mxu0 }
 0x1a6   : > { %v2668_v57 = vrot.slane %v2667_v21, 1  ;;  %v1484_v40 = vrot.slane %v1483_v32, 2 }
 0x1a7   : > { %v4390_v31 = vpop.eup %3641  ;;  %v2678_v59 = vmul.f32 1.442695, %v2670_v50  ;;  %v2682_v58 = vmul.f32 1.442695, %v2672_v49  ;;  %v4392_v63 = vpop.f32.mrf.mxu0  ;;  %v2686_v26 = vmul.f32 1.442695, %v2674_v51 }
 0x1a8   : > { %v4394_v5 = vpop.eup %3643  ;;  %v2669_v48 = vmax.f32 %v2667_v21, %v2668_v57  ;;  %1009 = vmax.xlane.f32.xlu1 %v1008_v47  ;;  %v1485_v4 = vadd.f32 %v1484_v40, %v1483_v32  ;;  %v2690_v13 = vmul.f32 1.442695, %v2676_v16  ;;  %v1477_v47 = vrot.slane %v1476_v44, 1 }
 0x1a9   : > { %v4396_v61 = vpop.eup %3645  ;;  %v2118_v10 = vadd.f32 %v4394_v5, %v4390_v31  ;;  %3661 = vpow2.f32 %v2678_v59  ;;  %v4402_v19 = vpop.f32.mrf.mxu0 }
 0x1aa   : > { %v4404_v25 = vpop.eup %3647  ;;  %3663 = vpow2.f32 %v2682_v58  ;;  %v2671_v7 = vsub.f32 %v4285_v0, %v2669_v48  ;;  %v2673_v28 = vsub.f32 %v4299_v17, %v2669_v48  ;;  %v2675_v20 = vsub.f32 %v4308_v35, %v2669_v48 }
 0x1ab   : > { %v4409_v29 = vpop.eup %3649  ;;  %v2119_v30 = vadd.f32 %v4396_v61, %v2118_v10  ;;  %v2677_v32 = vsub.f32 %v4314_v55, %v2669_v48  ;;  %v4413_v39 = vpop.f32.mrf.mxu0  ;;  %v1486_v21 = vrot.slane %v1485_v4, 1  ;;  %3665 = vpow2.f32 %v2686_v26 }
 0x1ac   : > { %v4415_v50 = vpop.eup %3651  ;;  %v2680_v49 = vmul.f32 1.442695, %v2671_v7  ;;  %v2684_v51 = vmul.f32 1.442695, %v2673_v28  ;;  %v2688_v0 = vmul.f32 1.442695, %v2675_v20  ;;  %1022 = vmax.xlane.f32.xlu1 %v1021_v8  ;;  %3667 = vpow2.f32 %v2690_v13 }
 0x1ad   : > { %v4417_v17 = vpop.eup %3653  ;;  %v2120_v35 = vadd.f32 %v4404_v25, %v2119_v30  ;;  %v2127_v16 = vadd.f32 %v4415_v50, %v4409_v29  ;;  %v2692_v55 = vmul.f32 1.442695, %v2677_v32  ;;  %v4422_v57 = vpop.f32.mrf.mxu0  ;;  %v1487_v7 = vadd.f32 %v1486_v21, %v1485_v4 }
 0x1ae   : > { %5260 = vst [vmem:[#allocation5_spill] sm:$0xff] %v4422_v57  ;;  %v4424_v40 = vpop.eup %3655  ;;  %3669 = vpow2.f32 %v2680_v49  ;;  %v1478_v28 = vadd.f32 %v1477_v47, %v1476_v44  ;;  %v914_v49 = vld [vmem:[%s5239_s4 + $0x18] sm:$0xff] }
 0x1af   : > { %v3658_v59 = vpop.eup %3657  ;;  %v2121_v58 = vrot.slane %v2120_v35, 4  ;;  %v2128_v26 = vadd.f32 %v4417_v17, %v2127_v16  ;;  %3671 = vpow2.f32 %v2684_v51  ;;  %v4427_v48 = vpop.f32.mrf.mxu0  ;;  %3500 = vmatprep.subr.msk.mxu1 %vm1011_vm5, %v914_v49 }
 0x1b0   : > { %5261 = vst [vmem:[#allocation6_spill] sm:$0xff] %v4427_v48  ;;  %v3660_v10 = vpop.eup %3659  ;;  %3673 = vpow2.f32 %v2688_v0  ;;  %v990_v8 = vmul.f32 0.17677669, %v3658_v59  ;;  %3501 = vmatpush3.xpose.msk.msra.mxu1 %vm1011_vm5, %v914_v49 }
 0x1b1   : > { %v2122_v20 = vadd.f32 %v2121_v58, %v2120_v35  ;;  %v2129_v13 = vadd.f32 %v4424_v40, %v2128_v26  ;;  %3675 = vpow2.f32 %v2692_v55  ;;  %v4430_v30 = vpop.f32.mrf.mxu0  ;;  %v989_v32 = vmul.f32 0.17677669, %v3660_v10 }
 0x1b2   : > { %5262 = vst [vmem:[#allocation7_spill] sm:$0xff] %v4430_v30  ;;  %v4436_v51 = vmul.f32 %v4301_v18, %v990_v8  ;;  %v4439_v16 = vmul.f32 %v4296_v6, %v990_v8  ;;  %v4442_v4 = vmul.f32 %v4287_v37, %v990_v8  ;;  %v4445_v44 = vmul.f32 %v4282_v60, %v990_v8 }
 0x1b3   : > { %v2123_v21 = vrot.slane %v2122_v20, 2  ;;  %v2130_v47 = vrot.slane %v2129_v13, 4  ;;  %v4447_v0 = vpop.f32.mrf.mxu0  ;;  %v4451_v35 = vmul.f32 %v4279_v34, %v989_v32  ;;  %v4454_v18 = vmul.f32 %v4270_v52, %v989_v32  ;;  %v913_v52 = vld [vmem:[%s5239_s4 + $0x10] sm:$0xff] }
 0x1b4   : > { %5263 = vst [vmem:[#allocation8_spill] sm:$0xff] %v4447_v0  ;;  %v4458_v37 = vmul.f32 %v4264_v45, %v989_v32  ;;  %v4461_v60 = vmul.f32 %v4260_v42, %v989_v32  ;;  %3677 = vrcp.f32 %v1487_v7  ;;  %v912_v45 = vld [vmem:[%s5239_s4 + $0x8] sm:$0xff]  ;;  %3502 = vmatprep.subr.msk.mxu1 %vm1011_vm5, %v913_v52 }
 0x1b5   : > { %v2124_v6 = vadd.f32 %v2123_v21, %v2122_v20  ;;  %v2131_v55 = vadd.f32 %v2130_v47, %v2129_v13  ;;  %v4463_v59 = vpop.f32.mrf.mxu0  ;;  %3679 = vrcp.f32 %v1478_v28  ;;  %3503 = vmatpush3.xpose.msk.msra.mxu1 %vm1011_vm5, %v913_v52 }
 0x1b6   : > { %5264 = vst [vmem:[#allocation9_spill] sm:$0xff] %v4461_v60  ;;  %5265 = vst [vmem:[#allocation10_spill] sm:$0xff] %v4463_v59  ;;  %v4465_v58 = vpop.eup %3661  ;;  %3504 = vmatprep.subr.msk.mxu1 %vm1011_vm5, %v912_v45 }
 0x1b7   : > { %v4473_v34 = vpop.eup %3663  ;;  %v4475_v42 = vpop.f32.mrf.mxu0  ;;  %v2132_v26 = vrot.slane %v2131_v55, 2  ;;  %v2125_v10 = vrot.slane %v2124_v6, 1 }
 0x1b8   : > { %5266 = vst [vmem:[#allocation11_spill] sm:$0xff] %v4475_v42  ;;  %v2694_v8 = vadd.f32 %v4473_v34, %v4465_v58  ;;  %v4481_v7 = vpop.eup %3665 }
 0x1b9   : > { %v4483_v28 = vpop.f32.mrf.mxu0  ;;  %v2133_v20 = vadd.f32 %v2132_v26, %v2131_v55  ;;  %v2126_v13 = vadd.f32 %v2125_v10, %v2124_v6  ;;  %v4486_v32 = vpop.eup %3667  ;;  %3505 = vmatpush3.xpose.msk.msra.mxu1 %vm1011_vm5, %v912_v45 }
 0x1ba   : > { %5267 = vst [vmem:[#allocation12_spill] sm:$0xff] %v4483_v28  ;;  %v2695_v49 = vadd.f32 %v4481_v7, %v2694_v8 }
 0x1bb   : > { %v4489_v21 = vpop.eup %3669  ;;  %v4491_v47 = vpop.f32.mrf.mxu0  ;;  %v2134_v2 = vrot.slane %v2133_v20, 1  ;;  %3681 = vrcp.f32 %v2126_v13  ;;  %v911_v13 = vld [vmem:[%s5239_s4] sm:$0xff] }
 0x1bc   : > { %5268 = vst [vmem:[#allocation13_spill] sm:$0xff] %v4491_v47  ;;  %v4493_v59 = vpop.eup %3671  ;;  %v2696_v52 = vadd.f32 %v4486_v32, %v2695_v49  ;;  %3506 = vmatprep.subr.msk.mxu1 %vm1011_vm5, %v911_v13 }
 0x1bd   : > { %v4497_v28 = vpop.eup %3673  ;;  %v2703_v6 = vadd.f32 %v4493_v59, %v4489_v21  ;;  %v4501_v55 = vpop.f32.mrf.mxu0  ;;  %v2135_v26 = vadd.f32 %v2134_v2, %v2133_v20  ;;  %3507 = vmatpush3.xpose.msk.msra.mxu1 %vm1011_vm5, %v911_v13 }
 0x1be   : > { %5269 = vst [vmem:[#allocation14_spill] sm:$0xff] %v4501_v55  ;;  %v4503_v10 = vpop.eup %3675  ;;  %v2697_v8 = vrot.slane %v2696_v52, 4 }
 0x1bf   : > { %v2704_v47 = vadd.f32 %v4497_v28, %v2703_v6  ;;  %v4509_v49 = vpop.f32.mrf.mxu0  ;;  %3683 = vrcp.f32 %v2135_v26 }
 0x1c0   : > { %5270 = vst [vmem:[#allocation15_spill] sm:$0xff] %v4509_v49  ;;  %v2698_v45 = vadd.f32 %v2697_v8, %v2696_v52 }
 0x1c1   : > { %v3678_v42 = vpop.eup %3677  ;;  %v2705_v2 = vadd.f32 %v4503_v10, %v2704_v47  ;;  %v4514_v20 = vpop.f32.mrf.mxu0 }
 0x1c2   : > { %5271 = vst [vmem:[#allocation16_spill] sm:$0xff] %v4514_v20  ;;  %v3680_v55 = vpop.eup %3679  ;;  %v2699_v30 = vrot.slane %v2698_v45, 2  ;;  %v1491_v0 = vmul.f32 0.17677669, %v3678_v42 }
 0x1c3   : > { %v2706_v57 = vrot.slane %v2705_v2, 4  ;;  %v4516_v48 = vpop.f32.mrf.mxu0  ;;  %v1490_v6 = vmul.f32 0.17677669, %v3680_v55 }
 0x1c4   : > { %v2700_v60 = vadd.f32 %v2699_v30, %v2698_v45  ;;  %v4519_v49 = vmul.f32 %v4363_v62, %v1491_v0  ;;  %v4522_v52 = vmul.f32 %v4358_v24, %v1491_v0  ;;  %v4525_v26 = vmul.f32 %v4349_v38, %v1491_v0 }
 0x1c5   : > { %v2707_v47 = vadd.f32 %v2706_v57, %v2705_v2  ;;  %v4527_v8 = vpop.f32.mrf.mxu0  ;;  %v4530_v13 = vmul.f32 %v4338_v23, %v1490_v6  ;;  %v4533_v42 = vmul.f32 %v4332_v11, %v1490_v6  ;;  %v4536_v30 = vmul.f32 %v4326_v3, %v1490_v6 }
 0x1c6   : > { %5272 = vst [vmem:[#allocation17_spill] sm:$0xff] %v4527_v8  ;;  %v4539_v62 = vmul.f32 %v4342_v27, %v1491_v0  ;;  %v4542_v24 = vmul.f32 %v4318_v54, %v1490_v6  ;;  %v2701_v38 = vrot.slane %v2700_v60, 1 }
 0x1c7   : > { %v2708_v55 = vrot.slane %v2707_v47, 2  ;;  %v4544_v57 = vpop.f32.mrf.mxu0 }
 0x1c8   : > { %v3682_v45 = vpop.eup %3681  ;;  %v2702_v2 = vadd.f32 %v2701_v38, %v2700_v60 }
 0x1c9   : > { %v2709_v23 = vadd.f32 %v2708_v55, %v2707_v47  ;;  %v4546_v8 = vpop.f32.mrf.mxu0  ;;  %v2138_v11 = vmul.f32 0.17677669, %v3682_v45 }
 0x1ca   : > { %3685 = vrcp.f32 %v2702_v2 }
 0x1cb   : > { %v2710_v20 = vrot.slane %v2709_v23, 1  ;;  %v4548_v3 = vpop.f32.mrf.mxu0  ;;  %v4551_v27 = vmul.f32 %v4404_v25, %v2138_v11  ;;  %v4554_v54 = vmul.f32 %v4396_v61, %v2138_v11  ;;  %v4557_v0 = vmul.f32 %v4394_v5, %v2138_v11 }
 0x1cc   : > { %v3684_v6 = vpop.eup %3683  ;;  %v4560_v60 = vmul.f32 %v4390_v31, %v2138_v11 }
 0x1cd   : > { %5273 = vst [vmem:[#allocation18_spill] sm:$0xff] %v4551_v27  ;;  %5274 = vst [vmem:[#allocation19_spill] sm:$0xff] %v4554_v54  ;;  %v2711_v47 = vadd.f32 %v2710_v20, %v2709_v23  ;;  %v4562_v38 = vpop.f32.mrf.mxu0  ;;  %v2139_v55 = vmul.f32 0.17677669, %v3684_v6 }
 0x1ce   : > { %5275 = vst [vmem:[#allocation20_spill] sm:$0xff] %v4557_v0  ;;  %5276 = vst [vmem:[#allocation21_spill] sm:$0xff] %v4560_v60 }
 0x1cf   : > { %3687 = vrcp.f32 %v2711_v47  ;;  %v4564_v45 = vpop.f32.mrf.mxu0  ;;  %v4567_v25 = vmul.f32 %v4424_v40, %v2139_v55  ;;  %v4570_v61 = vmul.f32 %v4417_v17, %v2139_v55  ;;  %v4573_v5 = vmul.f32 %v4415_v50, %v2139_v55 }
 0x1d0   : > { %v4576_v2 = vmul.f32 %v4409_v29, %v2139_v55 }
 0x1d1   : > { %5277 = vst [vmem:[#allocation22_spill] sm:$0xff] %v4570_v61  ;;  %5278 = vst [vmem:[#allocation23_spill] sm:$0xff] %v4573_v5  ;;  %v4578_v31 = vpop.f32.mrf.mxu0 }
 0x1d2   : > { %5279 = vst [vmem:[#allocation24_spill] sm:$0xff] %v4576_v2 }
 0x1d3   : > { %v4580_v20 = vpop.f32.mrf.mxu0 }
 0x1d5   : > { %v4582_v23 = vpop.f32.mrf.mxu0 }
 0x1d7   : > { %v3686_v11 = vpop.eup %3685  ;;  %v4584_v6 = vpop.f32.mrf.mxu0 }
 0x1d8   : > { %v2714_v40 = vmul.f32 0.17677669, %v3686_v11 }
 0x1d9   : > { %v4586_v47 = vpop.f32.mrf.mxu0 }
 0x1da   : > { %v4589_v17 = vmul.f32 %v4486_v32, %v2714_v40  ;;  %v4592_v50 = vmul.f32 %v4481_v7, %v2714_v40  ;;  %v4595_v29 = vmul.f32 %v4473_v34, %v2714_v40  ;;  %v4600_v60 = vmul.f32 %v4465_v58, %v2714_v40 }
 0x1db   : > { %v4597_v55 = vpop.f32.mrf.mxu0 }
 0x1dc   : > { %5280 = vst [vmem:[#allocation25_spill] sm:$0xff] %v4589_v17  ;;  %5281 = vst [vmem:[#allocation26_spill] sm:$0xff] %v4592_v50  ;;  %v3688_v2 = vpop.eup %3687 }
 0x1dd   : > { %5282 = vst [vmem:[#allocation27_spill] sm:$0xff] %v4595_v29  ;;  %5283 = vst [vmem:[#allocation28_spill] sm:$0xff] %v4600_v60  ;;  %v2715_v0 = vmul.f32 0.17677669, %v3688_v2  ;;  %v4602_v5 = vpop.f32.mrf.mxu0  ;;  %v1014_v2 = vpop.xlane.xlu1 %1013 }
 0x1df   : > { %v2723_v11 = vmul.f32 %v4503_v10, %v2715_v0  ;;  %v4605_v54 = vpop.f32.mrf.mxu0  ;;  %v4608_v32 = vmul.f32 %v4497_v28, %v2715_v0  ;;  %v4611_v7 = vmul.f32 %v4493_v59, %v2715_v0  ;;  %v4614_v34 = vmul.f32 %v4489_v21, %v2715_v0 }
 0x1e1   : > { %5284 = vst [vmem:[#allocation29_spill] sm:$0xff] %v4608_v32  ;;  %5285 = vst [vmem:[#allocation30_spill] sm:$0xff] %v4611_v7  ;;  %3086 = vmatprep.subr.mxu0 %v2723_v11  ;;  %v4616_v58 = vpop.f32.mrf.mxu0  ;;  %v1017_v60 = vpop.xlane.xlu1 %1016 }
 0x1e2   : > { %5286 = vst [vmem:[#allocation31_spill] sm:$0xff] %v4614_v34 }
 0x1e3   : > { %v819_v40 = vpop.f32.mrf.mxu0 }
 0x1e4   : > { %1229 = vmatprep.subr.mxu1 %v819_v40 }
 0x1e5   : > { %v1020_v29 = vpop.xlane.xlu1 %1019 }
 0x223   : > { %v1001_v10 = vpop.xlane.xlu0 %1000 }
 0x224   : > { %v1024_v50 = vmax.f32 %v1001_v10, %v1014_v2 }
 0x226   : > { %v1028_v17 = vsub.f32 %v4322_v43, %v1024_v50  ;;  %v1029_v28 = vsub.f32 %v4336_v22, %v1024_v50  ;;  %v1052_v59 = vsub.f32 %v4167_v9, %v1024_v50 }
 0x228   : > { %v1036_v7 = vmul.f32 1.442695, %v1028_v17  ;;  %v1056_v32 = vmul.f32 1.442695, %v1052_v59  ;;  %v1038_v21 = vmul.f32 1.442695, %v1029_v28 }
 0x229   : > { %v1004_v0 = vpop.xlane.xlu1 %1003 }
 0x22a   : > { %v1025_v11 = vmax.f32 %v1004_v0, %v1017_v60  ;;  %3689 = vpow2.f32 %v1036_v7 }
 0x22b   : > { %3691 = vpow2.f32 %v1056_v32 }
 0x22c   : > { %v1030_v40 = vsub.f32 %v4347_v33, %v1025_v11  ;;  %v1031_v34 = vsub.f32 %v4356_v53, %v1025_v11  ;;  %v1053_v61 = vsub.f32 %v4179_v12, %v1025_v11  ;;  %3693 = vpow2.f32 %v1038_v21 }
 0x22d   : > { %v1007_v2 = vpop.xlane.xlu1 %1006 }
 0x22e   : > { %v1040_v43 = vmul.f32 1.442695, %v1030_v40  ;;  %v1042_v10 = vmul.f32 1.442695, %v1031_v34  ;;  %v1058_v22 = vmul.f32 1.442695, %v1053_v61  ;;  %v1026_v27 = vmax.f32 %v1007_v2, %v1020_v29 }
 0x230   : > { %3695 = vpow2.f32 %v1040_v43  ;;  %v1032_v9 = vsub.f32 %v4361_v46, %v1026_v27  ;;  %v1033_v17 = vsub.f32 %v4368_v14, %v1026_v27  ;;  %v1054_v60 = vsub.f32 %v4191_v15, %v1026_v27 }
 0x231   : > { %3697 = vpow2.f32 %v1042_v10  ;;  %v1010_v50 = vpop.xlane.xlu1 %1009 }
 0x232   : > { %3699 = vpow2.f32 %v1058_v22  ;;  %v1044_v33 = vmul.f32 1.442695, %v1032_v9  ;;  %v1046_v53 = vmul.f32 1.442695, %v1033_v17  ;;  %v1060_v32 = vmul.f32 1.442695, %v1054_v60 }
 0x234   : > { %3701 = vpow2.f32 %v1044_v33  ;;  %v5288_v33 = vld [vmem:[#allocation6_spill] sm:$0xff] }
 0x235   : > { %3703 = vpow2.f32 %v1046_v53  ;;  %v1023_v12 = vpop.xlane.xlu1 %1022  ;;  %v5289_v53 = vld [vmem:[#allocation5_spill] sm:$0xff] }
 0x236   : > { %3705 = vpow2.f32 %v1060_v32  ;;  %v1027_v7 = vmax.f32 %v1010_v50, %v1023_v12  ;;  %v1506_v32 = vmax.f32 %v5289_v53, %v5288_v33  ;;  %v385_v12 = vld [vmem:[%s5237_s2 + $0x128] sm:$0xff] }
 0x237   : > { %v3690_v61 = vpop.eup %3689 }
 0x238   : > { %v1034_v29 = vsub.f32 %v4372_v36, %v1027_v7  ;;  %v1035_v46 = vsub.f32 %v4374_v41, %v1027_v7  ;;  %v1055_v14 = vsub.f32 %v4388_v1, %v1027_v7  ;;  %v3692_v34 = vpop.eup %3691 }
 0x239   : > { %v3694_v15 = vpop.eup %3693  ;;  %3508 = vmatprep.mubr.msk.f32.mxu1 %vm1011_vm5, %v3692_v34  ;;  %v1076_v21 = vsel %vm1011_vm5, %v3692_v34, 0.0  ;;  %v387_v34 = vld [vmem:[%s5237_s2 + $0x138] sm:$0xff] }
 0x23a   : > { %v1048_v27 = vmul.f32 1.442695, %v1034_v29  ;;  %v1050_v28 = vmul.f32 1.442695, %v1035_v46  ;;  %v1062_v59 = vmul.f32 1.442695, %v1055_v14  ;;  %1077 = vadd.xlane.f32.xlu1 %v1076_v21  ;;  %v1064_v36 = vadd.f32 %v3694_v15, %v3690_v61 }
 0x23b   : > { %v5292_v29 = vld [vmem:[#allocation7_spill] sm:$0xff] }
 0x23c   : > { %3707 = vpow2.f32 %v1048_v27  ;;  %v386_v14 = vld [vmem:[%s5237_s2 + $0x130] sm:$0xff] }
 0x23d   : > { %v3696_v0 = vpop.eup %3695  ;;  %3709 = vpow2.f32 %v1050_v28 }
 0x23e   : > { %v3698_v11 = vpop.eup %3697  ;;  %3711 = vpow2.f32 %v1062_v59  ;;  %1065 = vadd.xlane.f32.xlu1 %v1064_v36 }
 0x23f   : > { %v3700_v40 = vpop.eup %3699  ;;  %v1067_v41 = vadd.f32 %v3698_v11, %v3696_v0 }
 0x240   : > { %3509 = vmatmul.mubr.msk.f32.vlgmr.msra.gmra.mxu1 %vm1011_vm5, %v3700_v40  ;;  %v1079_v10 = vsel %vm1011_vm5, %v3700_v40, 0.0 }
 0x241   : > { %v3702_v1 = vpop.eup %3701  ;;  %1230 = vmatpush1.xpose.msra.mxu1 %v4616_v58  ;;  %1068 = vadd.xlane.f32.xlu0 %v1067_v41 }
 0x242   : > { %v3704_v2 = vpop.eup %3703  ;;  %1231 = vmatprep.subr.mxu1 %v4605_v54  ;;  %1080 = vadd.xlane.f32.xlu1 %v1079_v10 }
 0x243   : > { %v3706_v43 = vpop.eup %3705  ;;  %v1070_v22 = vadd.f32 %v3704_v2, %v3702_v1 }
 0x244   : > { %3511 = vmatprep.mubr.msk.f32.mxu1 %vm1011_vm5, %v3706_v43  ;;  %v1082_v9 = vsel %vm1011_vm5, %v3706_v43, 0.0 }
 0x245   : > { %1232 = vmatpush1.xpose.msra.mxu1 %v4602_v5  ;;  %1071 = vadd.xlane.f32.xlu0 %v1070_v22  ;;  %v4647_v5 = vld [vmem:[%s5238_s3 + $0x20] sm:$0xff] }
 0x246   : > { %1233 = vmatprep.subr.mxu1 %v4597_v55  ;;  %1083 = vadd.xlane.f32.xlu1 %v1082_v9 }
 0x249   : > { %v3708_v58 = vpop.eup %3707  ;;  %1234 = vmatpush1.xpose.msra.mxu1 %v4586_v47  ;;  %v4656_v47 = vld [vmem:[%s5238_s3 + $0x28] sm:$0xff] }
 0x24a   : > { %v3710_v17 = vpop.eup %3709  ;;  %1235 = vmatprep.subr.mxu1 %v4584_v6  ;;  %v1512_v6 = vsel %vm1011_vm5, %v4647_v5, -inf }
 0x24b   : > { %v3712_v54 = vpop.eup %3711  ;;  %v1073_v60 = vadd.f32 %v3710_v17, %v3708_v58 }
 0x24c   : > { %3512 = vmatmul.mubr.msk.f32.gmra.mxu1 %vm1011_vm5, %v3712_v54  ;;  %v1085_v50 = vsel %vm1011_vm5, %v3712_v54, 0.0 }
 0x24d   : > { %1236 = vmatpush1.xpose.msra.mxu1 %v4582_v23  ;;  %1269 = vmatprep.mubr.f32.mxu1 %v3694_v15  ;;  %v1500_v23 = vmax.f32 %v4383_v56, %v4392_v63 }
 0x24e   : > { %1086 = vadd.xlane.f32.xlu1 %v1085_v50  ;;  %1363 = vmatprep.subr.mxu1 %v4436_v51  ;;  %v1515_v51 = vsel %vm1011_vm5, %v4656_v47, -inf }
 0x24f   : > { %1074 = vadd.xlane.f32.xlu0 %v1073_v60 }
 0x250   : > { %1270 = vmatmul.mubr.f32.vlgmr.msra.gmra.mxu1 %v3690_v61  ;;  %v5291_v61 = vld [vmem:[#allocation8_spill] sm:$0xff] }
 0x251   : > { %1364 = vmatpush1.msra.mxu1 %v4451_v35  ;;  %1274 = vmatprep.mubr.f32.mxu1 %v3698_v11  ;;  %v4669_v35 = vld [vmem:[%s5238_s3 + $0x30] sm:$0xff]  ;;  %v1509_v46 = vmax.f32 %v5292_v29, %v5291_v61 }
 0x252   : > { %1365 = vmatprep.subr.mxu1 %v4439_v16  ;;  %1513 = vmax.xlane.f32.xlu1 %v1512_v6  ;;  %v1503_v16 = vmax.f32 %v4402_v19, %v4413_v39  ;;  %v1518_v55 = vsel %vm1011_vm5, %v4669_v35, -inf }
 0x253   : > { %1501 = vmax.xlane.f32.xlu0 %v1500_v23  ;;  %1366 = vmatpush1.msra.mxu1 %v4454_v18  ;;  %v384_v18 = vld [vmem:[%s5237_s2 + $0x120] sm:$0xff] }
 0x254   : > { %1367 = vmatprep.subr.mxu1 %v4442_v4  ;;  %1275 = vmatmul.mubr.f32.gmra.mxu1 %v3696_v0  ;;  %v5287_v4 = vld [vmem:[#allocation9_spill] sm:$0xff] }
 0x255   : > { %1368 = vmatpush1.msra.mxu1 %v4458_v37  ;;  %1279 = vmatprep.mubr.f32.mxu1 %v3704_v2  ;;  %v4684_v37 = vld [vmem:[%s5238_s3 + $0x38] sm:$0xff] }
 0x256   : > { %1369 = vmatprep.subr.mxu1 %v4445_v44  ;;  %1516 = vmax.xlane.f32.xlu1 %v1515_v51  ;;  %v5290_v44 = vmov 0.0   ;;  %v1521_v7 = vsel %vm1011_vm5, %v4684_v37, -inf }
 0x257   : > { %1504 = vmax.xlane.f32.xlu0 %v1503_v16  ;;  %1370 = vmatpush1.msra.mxu1 %v5287_v4 }
 0x258   : > { %1280 = vmatmul.mubr.f32.gmra.mxu1 %v3702_v1  ;;  %3397 = vmatmul.mubr.msk.f32.gmra.mxu0 %vm396_vm4, %v384_v18 }
 0x259   : > { %1284 = vmatprep.mubr.f32.mxu1 %v3710_v17  ;;  %827 = vmatprep.mubr.f32.mxu0 %v5290_v44 }
 0x25a   : > { %1519 = vmax.xlane.f32.xlu1 %v1518_v55 }
 0x25b   : > { %1507 = vmax.xlane.f32.xlu0 %v1506_v32 }
 0x25c   : > { %1285 = vmatmul.mubr.f32.gmra.mxu1 %v3708_v58  ;;  %3398 = vmatmul.mubr.msk.f32.gmra.mxu0 %vm396_vm4, %v385_v12 }
 0x25d   : > { %833 = vmatprep.mubr.f32.mxu0 %v5290_v44  ;;  %1403 = vmatprep.mubr.f32.mxu1 %v5290_v44 }
 0x25e   : > { %1522 = vmax.xlane.f32.xlu1 %v1521_v7 }
 0x25f   : > { %1510 = vmax.xlane.f32.xlu0 %v1509_v46 }
 0x260   : > { %3399 = vmatmul.mubr.msk.f32.gmra.mxu0 %vm396_vm4, %v386_v14 }
 0x261   : > { %839 = vmatprep.mubr.f32.mxu0 %v5290_v44 }
 0x264   : > { %3400 = vmatmul.mubr.msk.f32.gmra.mxu0 %vm396_vm4, %v387_v34 }
 0x265   : > { %845 = vmatprep.mubr.f32.mxu0 %v5290_v44 }
 0x2c3   : > { %v4710_v15 = vpop.xlane.xlu1 %1077 }
 0x2c7   : > { %v4712_v27 = vpop.xlane.xlu1 %1065 }
 0x2ca   : > { %v4716_v59 = vpop.xlane.xlu0 %1068 }
 0x2cb   : > { %v4714_v28 = vpop.xlane.xlu1 %1080 }
 0x2ce   : > { %v4720_v0 = vpop.xlane.xlu0 %1071 }
 0x2cf   : > { %v4718_v21 = vpop.xlane.xlu1 %1083 }
 0x2d7   : > { %v4722_v11 = vpop.xlane.xlu1 %1086 }
 0x2d8   : > { %v4724_v36 = vpop.xlane.xlu0 %1074 }
 0x2db   : > { %v1514_v40 = vpop.xlane.xlu1 %1513 }
 0x2dc   : > { %v1502_v41 = vpop.xlane.xlu0 %1501 }
 0x2dd   : > { %v1524_v1 = vmax.f32 %v1502_v41, %v1514_v40 }
 0x2df   : > { %v1528_v2 = vsub.f32 %v4383_v56, %v1524_v1  ;;  %v1529_v43 = vsub.f32 %v4392_v63, %v1524_v1  ;;  %v1552_v10 = vsub.f32 %v4647_v5, %v1524_v1  ;;  %v1517_v22 = vpop.xlane.xlu1 %1516 }
 0x2e0   : > { %v1505_v9 = vpop.xlane.xlu0 %1504 }
 0x2e1   : > { %v1536_v58 = vmul.f32 1.442695, %v1528_v2  ;;  %v1538_v17 = vmul.f32 1.442695, %v1529_v43  ;;  %v1525_v54 = vmax.f32 %v1505_v9, %v1517_v22  ;;  %v1556_v60 = vmul.f32 1.442695, %v1552_v10 }
 0x2e3   : > { %3713 = vpow2.f32 %v1536_v58  ;;  %v1530_v50 = vsub.f32 %v4402_v19, %v1525_v54  ;;  %v1531_v6 = vsub.f32 %v4413_v39, %v1525_v54  ;;  %v1520_v23 = vpop.xlane.xlu1 %1519  ;;  %v1553_v63 = vsub.f32 %v4656_v47, %v1525_v54 }
 0x2e4   : > { %3715 = vpow2.f32 %v1538_v17  ;;  %v1508_v51 = vpop.xlane.xlu0 %1507  ;;  %v1088_v54 = vadd.f32 %v4710_v15, %v4712_v27  ;;  %v1090_v15 = vadd.f32 %v4718_v21, %v4720_v0 }
 0x2e5   : > { %v1540_v16 = vmul.f32 1.442695, %v1530_v50  ;;  %v1542_v56 = vmul.f32 1.442695, %v1531_v6  ;;  %v1526_v18 = vmax.f32 %v1508_v51, %v1520_v23  ;;  %3717 = vpow2.f32 %v1556_v60 }
 0x2e6   : > { %v1558_v19 = vmul.f32 1.442695, %v1553_v63  ;;  %v1089_v6 = vadd.f32 %v4714_v28, %v4716_v59  ;;  %v1091_v59 = vadd.f32 %v4722_v11, %v4724_v36 }
 0x2e7   : > { %3719 = vpow2.f32 %v1540_v16  ;;  %v1532_v5 = vsub.f32 %v5289_v53, %v1526_v18  ;;  %v1533_v4 = vsub.f32 %v5288_v33, %v1526_v18  ;;  %v1523_v55 = vpop.xlane.xlu1 %1522  ;;  %v1554_v46 = vsub.f32 %v4669_v35, %v1526_v18 }
 0x2e8   : > { %3721 = vpow2.f32 %v1542_v56  ;;  %v1511_v32 = vpop.xlane.xlu0 %1510 }
 0x2e9   : > { %v1544_v12 = vmul.f32 1.442695, %v1532_v5  ;;  %v1527_v39 = vmax.f32 %v1511_v32, %v1523_v55  ;;  %v1546_v7 = vmul.f32 1.442695, %v1533_v4  ;;  %3723 = vpow2.f32 %v1558_v19 }
 0x2ea   : > { %v1560_v40 = vmul.f32 1.442695, %v1554_v46 }
 0x2eb   : > { %3725 = vpow2.f32 %v1544_v12  ;;  %v1534_v47 = vsub.f32 %v5292_v29, %v1527_v39  ;;  %v1535_v53 = vsub.f32 %v5291_v61, %v1527_v39  ;;  %v1555_v10 = vsub.f32 %v4684_v37, %v1527_v39  ;;  %v918_v39 = vld [vmem:[%s5239_s4 + $0x38] sm:$0xff] }
 0x2ec   : > { %3727 = vpow2.f32 %v1546_v7  ;;  %3514 = vmatprep.subr.msk.mxu1 %vm1011_vm5, %v918_v39 }
 0x2ed   : > { %v1548_v1 = vmul.f32 1.442695, %v1534_v47  ;;  %v1550_v35 = vmul.f32 1.442695, %v1535_v53  ;;  %3729 = vpow2.f32 %v1560_v40  ;;  %v1562_v22 = vmul.f32 1.442695, %v1555_v10 }
 0x2ef   : > { %3731 = vpow2.f32 %v1548_v1 }
 0x2f0   : > { %v4735_v14 = vpop.eup %3713  ;;  %3733 = vpow2.f32 %v1550_v35 }
 0x2f1   : > { %v4737_v34 = vpop.eup %3715  ;;  %3735 = vpow2.f32 %v1562_v22 }
 0x2f2   : > { %v1564_v33 = vadd.f32 %v4737_v34, %v4735_v14  ;;  %v4743_v41 = vpop.eup %3717  ;;  %3737 = vrcp.f32 %v1088_v54  ;;  %v5294_v54 = vld [vmem:[#allocation10_spill] sm:$0xff] }
 0x2f3   : > { %v1576_v29 = vsel %vm1011_vm5, %v4743_v41, 0.0  ;;  %3739 = vrcp.f32 %v1089_v6  ;;  %v5295_v6 = vld [vmem:[#allocation13_spill] sm:$0xff] }
 0x2f4   : > { %1565 = vadd.xlane.f32.xlu1 %v1564_v33  ;;  %v4745_v2 = vpop.eup %3719  ;;  %3741 = vrcp.f32 %v1090_v15  ;;  %v4797_v15 = vld [vmem:[%s5238_s3 + $0x48] sm:$0xff] }
 0x2f5   : > { %v4747_v43 = vpop.eup %3721  ;;  %3743 = vrcp.f32 %v1091_v59 }
 0x2f6   : > { %v1567_v61 = vadd.f32 %v4747_v43, %v4745_v2  ;;  %v4754_v9 = vpop.eup %3723 }
 0x2f7   : > { %v1579_v37 = vsel %vm1011_vm5, %v4754_v9, 0.0 }
 0x2f8   : > { %1577 = vadd.xlane.f32.xlu1 %v1576_v29  ;;  %v4756_v58 = vpop.eup %3725 }
 0x2f9   : > { %v4758_v17 = vpop.eup %3727 }
 0x2fa   : > { %v1570_v60 = vadd.f32 %v4758_v17, %v4756_v58  ;;  %v4766_v50 = vpop.eup %3729 }
 0x2fb   : > { %v1582_v56 = vsel %vm1011_vm5, %v4766_v50, 0.0 }
 0x2fc   : > { %1568 = vadd.xlane.f32.xlu1 %v1567_v61  ;;  %v4770_v23 = vpop.eup %3731 }
 0x2fd   : > { %v4772_v16 = vpop.eup %3733 }
 0x2fe   : > { %v1573_v18 = vadd.f32 %v4772_v16, %v4770_v23  ;;  %v4780_v63 = vpop.eup %3735 }
 0x2ff   : > { %v1585_v4 = vsel %vm1011_vm5, %v4780_v63, 0.0  ;;  %v3738_v0 = vpop.eup %3737 }
 0x300   : > { %1580 = vadd.xlane.f32.xlu1 %v1579_v37  ;;  %v3510_v51 = vpop.f32.mrf.mxu1  ;;  %v3740_v11 = vpop.eup %3739  ;;  %v5293_v37 = vld [vmem:[#allocation11_spill] sm:$0xff] }
 0x301   : > { %v3742_v33 = vpop.eup %3741 }
 0x302   : > { %v1186_v27 = vpop.f32.mrf.mxu1  ;;  %v3744_v29 = vpop.eup %3743 }
 0x304   : > { %1571 = vadd.xlane.f32.xlu1 %v1570_v60  ;;  %v2148_v60 = vmax.f32 %v5294_v54, %v5293_v37 }
 0x308   : > { %1583 = vadd.xlane.f32.xlu1 %v1582_v56 }
 0x30c   : > { %1574 = vadd.xlane.f32.xlu1 %v1573_v18  ;;  %v3513_v28 = vpop.f32.mrf.mxu1  ;;  %v4804_v18 = vld [vmem:[%s5240_s5] sm:$0xff] }
 0x30e   : > { %v1196_v5 = vpop.f32.mrf.mxu1 }
 0x310   : > { %1586 = vadd.xlane.f32.xlu1 %v1585_v4  ;;  %v1271_v55 = vpop.f32.mrf.mxu1  ;;  %v5298_v4 = vld [vmem:[#allocation14_spill] sm:$0xff] }
 0x311   : > { %v1272_v21 = vadd.f32 %v1271_v55, %v1186_v27  ;;  %v2163_v27 = vsel %vm1011_vm5, %v4797_v15, -inf }
 0x312   : > { %v1273_v32 = vpop.f32.mrf.mxu1 }
 0x313   : > { %v1290_v19 = vmul.f32 %v3738_v0, %v1272_v21 }
 0x314   : > { %v1276_v12 = vpop.f32.mrf.mxu1 }
 0x315   : > { %v1277_v7 = vadd.f32 %v3510_v51, %v1276_v12  ;;  %1294 = vxpose.xlu0.b32.start [1/4] (short) (narrow) %v1290_v19, 32  ;;  %v5296_v51 = vld [vmem:[#allocation12_spill] sm:$0xff]  ;;  %v917_v19 = vld [vmem:[%s5239_s4 + $0x30] sm:$0xff] }
 0x316   : > { %v1278_v36 = vpop.f32.mrf.mxu1  ;;  %v2151_v56 = vmax.f32 %v5296_v51, %v5295_v6 }
 0x317   : > { %v1291_v46 = vmul.f32 %v3740_v11, %v1277_v7  ;;  %v916_v11 = vld [vmem:[%s5239_s4 + $0x28] sm:$0xff] }
 0x318   : > { %v1281_v47 = vpop.f32.mrf.mxu1 }
 0x319   : > { %v1282_v53 = vadd.f32 %v1281_v47, %v1196_v5  ;;  %1295 = vxpose.xlu0.b32.cont [2/4] (short) (narrow) %v1291_v46, 32  ;;  %v5297_v5 = vld [vmem:[#allocation15_spill] sm:$0xff]  ;;  %v915_v47 = vld [vmem:[%s5239_s4 + $0x20] sm:$0xff] }
 0x31a   : > { %v1283_v40 = vpop.f32.mrf.mxu1  ;;  %v2154_v55 = vmax.f32 %v5298_v4, %v5297_v5 }
 0x31b   : > { %v1292_v1 = vmul.f32 %v3742_v33, %v1282_v53 }
 0x31c   : > { %v1286_v35 = vpop.f32.mrf.mxu1 }
 0x31d   : > { %v1287_v10 = vadd.f32 %v3513_v28, %v1286_v35  ;;  %1296 = vxpose.xlu0.b32.cont [3/4] (short) (narrow) %v1292_v1, 32  ;;  %v823_v28 = vpop.f32.mrf.mxu0 }
 0x31e   : > { %v1288_v61 = vpop.f32.mrf.mxu1 }
 0x31f   : > { %v1293_v22 = vmul.f32 %v3744_v29, %v1287_v10  ;;  %v825_v59 = vpop.f32.mrf.mxu0 }
 0x321   : > { %1297 = vxpose.xlu0.b32.end [4/4] (short) (narrow) %v1293_v22, 32  ;;  %v829_v21 = vpop.f32.mrf.mxu0 }
 0x323   : > { %v831_v0 = vpop.f32.mrf.mxu0 }
 0x325   : > { %v835_v12 = vpop.f32.mrf.mxu0 }
 0x327   : > { %v837_v36 = vpop.f32.mrf.mxu0 }
 0x34e   : > { %2149 = vmax.xlane.f32.xlu0 %v2148_v60 }
 0x352   : > { %2152 = vmax.xlane.f32.xlu0 %v2151_v56 }
 0x356   : > { %2164 = vmax.xlane.f32.xlu0 %v2163_v27 }
 0x36c   : > { %1928 = vrot.lane.b32.xlu0 %v4804_v18, %s3889_s25  ;;  %s3358_s25 = sshll.u32 %s296_s24, 4 }
 0x36d   : > { %s298_s10 = scalar_lea.vmem [#allocation2], %s3358_s25 }
 0x36e   : > { %s3295_s12 = sshll.u32 %s298_s10, 4  ;;  %s3296_s12 = int_to_ptr.vmem [resolvable:$true] %s3295_s12 }
 0x36f   : > { %s3825_s20 = scalar_lea.vmem %s3296_s12, 256  ;;  %p3832_p0 = scmp.lt.s32.totalorder %s3296_s12, %s3830_s22 }
 0x370   : > { %p3826_p11 = scmp.ne.s32.totalorder %s3296_s12, %s3825_s20  ;;  %p3833_p1 = scmp.lt.s32.totalorder %s3831_s9, %s3825_s20 }
 0x372   : > { %p3827_p12 = pnand %p3826_p11, %p3976_p5  ;;  %p3834_p2 = por %p3833_p1, %p3832_p0 }
 0x374   : > { %p3828_p13 = pneg %p3827_p12 }
 0x376   : > { %p3835_p3 = pnand %p3834_p2, %p3828_p13 }
 0x38b   : > { %2155 = vmax.xlane.f32.xlu0 %v2154_v55 }
 0x391   : > { %v1310_v32 = vpop.trf.xlu0 }
 0x392   : > { %3417 = vmatmul.mubr.msk.f32.vlgmr.msra.gmra.mxu1 %vm1326_vm6, %v1310_v32 }
 0x393   : > { %3515 = vmatpush3.xpose.msk.msra.mxu1 %vm1011_vm5, %v918_v39  ;;  %1409 = vmatprep.mubr.f32.mxu1 %v5290_v44  ;;  %v841_v39 = vpop.f32.mrf.mxu0 }
 0x394   : > { %3516 = vmatprep.subr.msk.mxu1 %vm1011_vm5, %v917_v19 }
 0x395   : > { %v1311_v7 = vpop.trf.xlu0  ;;  %v843_v33 = vpop.f32.mrf.mxu0 }
 0x396   : > { %3418 = vmatmul.mubr.msk.f32.gmra.mxu1 %vm1326_vm6, %v1311_v7 }
 0x397   : > { %3517 = vmatpush3.xpose.msk.msra.mxu1 %vm1011_vm5, %v917_v19  ;;  %1415 = vmatprep.mubr.f32.mxu1 %v5290_v44 }
 0x398   : > { %3518 = vmatprep.subr.msk.mxu1 %vm1011_vm5, %v916_v11 }
 0x399   : > { %v1312_v46 = vpop.trf.xlu0 }
 0x39a   : > { %3419 = vmatmul.mubr.msk.f32.gmra.mxu1 %vm1326_vm6, %v1312_v46 }
 0x39b   : > { %3519 = vmatpush3.xpose.msk.msra.mxu1 %vm1011_vm5, %v916_v11  ;;  %1421 = vmatprep.mubr.f32.mxu1 %v5290_v44 }
 0x39c   : > { %3520 = vmatprep.subr.msk.mxu1 %vm1011_vm5, %v915_v47 }
 0x39d   : > { %v1313_v53 = vpop.trf.xlu0 }
 0x39e   : > { %3420 = vmatmul.mubr.msk.f32.gmra.mxu1 %vm1326_vm6, %v1313_v53 }
 0x39f   : > { %3521 = vmatpush3.xpose.msk.msra.mxu1 %vm1011_vm5, %v915_v47  ;;  %3522 = vmatprep.mubr.msk.f32.mxu1 %vm1011_vm5, %v4743_v41  ;;  %v388_v47 = vld [vmem:[%s5237_s2 + $0x140] sm:$0xff] }
 0x3a0   : > { %1729 = vmatprep.subr.mxu1 %v843_v33  ;;  %3401 = vmatmul.mubr.msk.f32.gmra.mxu0 %vm396_vm4, %v388_v47  ;;  %v389_v33 = vld [vmem:[%s5237_s2 + $0x148] sm:$0xff] }
 0x3a1   : > { %851 = vmatprep.mubr.f32.mxu0 %v5290_v44 }
 0x3a2   : > { %3523 = vmatmul.mubr.msk.f32.vlgmr.msra.gmra.mxu1 %vm1011_vm5, %v4754_v9 }
 0x3a3   : > { %1730 = vmatpush1.xpose.msra.mxu1 %v841_v39  ;;  %3525 = vmatprep.mubr.msk.f32.mxu1 %vm1011_vm5, %v4766_v50 }
 0x3a4   : > { %1731 = vmatprep.subr.mxu1 %v837_v36  ;;  %3402 = vmatmul.mubr.msk.f32.gmra.mxu0 %vm396_vm4, %v389_v33 }
 0x3a5   : > { %857 = vmatprep.mubr.f32.mxu0 %v5290_v44 }
 0x3a6   : > { %3526 = vmatmul.mubr.msk.f32.gmra.mxu1 %vm1011_vm5, %v4780_v63 }
 0x3a7   : > { %1732 = vmatpush1.xpose.msra.mxu1 %v835_v12  ;;  %1769 = vmatprep.mubr.f32.mxu1 %v4737_v34 }
 0x3a8   : > { %1733 = vmatprep.subr.mxu1 %v831_v0 }
 0x3ab   : > { %1734 = vmatpush1.xpose.msra.mxu1 %v829_v21 }
 0x3ac   : > { %1735 = vmatprep.subr.mxu1 %v825_v59 }
 0x3af   : > { %1736 = vmatpush1.xpose.msra.mxu1 %v823_v28 }
 0x3b0   : > { %1862 = vmatprep.subr.mxu1 %v4519_v49  ;;  %v1566_v49 = vpop.xlane.xlu1 %1565 }
 0x3b2   : > { %1770 = vmatmul.mubr.f32.vlgmr.msra.gmra.mxu1 %v4735_v14 }
 0x3b3   : > { %1774 = vmatprep.mubr.f32.mxu1 %v4747_v43  ;;  %1863 = vmatpush1.msra.mxu1 %v4530_v13 }
 0x3b4   : > { %1864 = vmatprep.subr.mxu1 %v4522_v52  ;;  %v1578_v52 = vpop.xlane.xlu1 %1577 }
 0x3b5   : > { %1865 = vmatpush1.msra.mxu1 %v4533_v42 }
 0x3b6   : > { %1775 = vmatmul.mubr.f32.gmra.mxu1 %v4745_v2  ;;  %1866 = vmatprep.subr.mxu1 %v4525_v26 }
 0x3b7   : > { %1779 = vmatprep.mubr.f32.mxu1 %v4758_v17  ;;  %1867 = vmatpush1.msra.mxu1 %v4536_v30 }
 0x3b8   : > { %1868 = vmatprep.subr.mxu1 %v4539_v62  ;;  %v1569_v13 = vpop.xlane.xlu1 %1568 }
 0x3b9   : > { %1869 = vmatpush1.msra.mxu1 %v4542_v24 }
 0x3ba   : > { %1780 = vmatmul.mubr.f32.gmra.mxu1 %v4756_v58  ;;  %v1588_v58 = vadd.f32 %v1578_v52, %v1566_v49  ;;  %v390_v49 = vld [vmem:[%s5237_s2 + $0x150] sm:$0xff]  ;;  %v391_v52 = vld [vmem:[%s5237_s2 + $0x158] sm:$0xff] }
 0x3bb   : > { %1784 = vmatprep.mubr.f32.mxu1 %v4772_v16  ;;  %3403 = vmatmul.mubr.msk.f32.gmra.mxu0 %vm396_vm4, %v390_v49 }
 0x3bc   : > { %v1581_v42 = vpop.xlane.xlu1 %1580  ;;  %3745 = vrcp.f32 %v1588_v58  ;;  %863 = vmatprep.mubr.f32.mxu0 %v5290_v44  ;;  %v5299_v58 = vld [vmem:[#allocation16_spill] sm:$0xff] }
 0x3be   : > { %1785 = vmatmul.mubr.f32.gmra.mxu1 %v4770_v23  ;;  %v1589_v23 = vadd.f32 %v1581_v42, %v1569_v13  ;;  %v903_v13 = vld [vmem:[%s5238_s3 + $0x40] sm:$0xff] }
 0x3bf   : > { %1902 = vmatprep.mubr.f32.mxu1 %v5290_v44  ;;  %3404 = vmatmul.mubr.msk.f32.gmra.mxu0 %vm396_vm4, %v391_v52  ;;  %v2160_v42 = vsel %vm1011_vm5, %v903_v13, -inf }
 0x3c0   : > { %v1572_v24 = vpop.xlane.xlu1 %1571  ;;  %3747 = vrcp.f32 %v1589_v23  ;;  %869 = vmatprep.mubr.f32.mxu0 %v5290_v44 }
 0x3c4   : > { %v1584_v43 = vpop.xlane.xlu1 %1583 }
 0x3c5   : > { %v1590_v63 = vadd.f32 %v1584_v43, %v1572_v24  ;;  %v4900_v24 = vld [vmem:[%s5238_s3 + $0x50] sm:$0xff] }
 0x3c6   : > { %v2166_v43 = vsel %vm1011_vm5, %v4900_v24, -inf }
 0x3c7   : > { %3749 = vrcp.f32 %v1590_v63 }
 0x3c8   : > { %v1575_v50 = vpop.xlane.xlu1 %1574 }
 0x3c9   : > { %v3746_v22 = vpop.eup %3745 }
 0x3cc   : > { %v1587_v40 = vpop.xlane.xlu1 %1586 }
 0x3cd   : > { %v1591_v35 = vadd.f32 %v1587_v40, %v1575_v50  ;;  %v3748_v59 = vpop.eup %3747  ;;  %v4909_v50 = vld [vmem:[%s5238_s3 + $0x58] sm:$0xff] }
 0x3ce   : > { %v2169_v23 = vsel %vm1011_vm5, %v4909_v50, -inf }
 0x3cf   : > { %3751 = vrcp.f32 %v1591_v35 }
 0x3d4   : > { %v3750_v19 = vpop.eup %3749 }
 0x3d7   : > { %v2150_v35 = vpop.xlane.xlu0 %2149 }
 0x3dc   : > { %v3752_v46 = vpop.eup %3751 }
 0x452   : > { %v4857_v26 = vpop.f32.mrf.mxu1 }
 0x454   : > { %v4859_v14 = vpop.f32.mrf.mxu1 }
 0x456   : > { %v4861_v30 = vpop.f32.mrf.mxu1 }
 0x458   : > { %v4863_v62 = vpop.f32.mrf.mxu1 }
 0x45a   : > { %v4865_v34 = vpop.f32.mrf.mxu1 }
 0x45c   : > { %v4867_v41 = vpop.f32.mrf.mxu1 }
 0x45e   : > { %v4869_v2 = vpop.f32.mrf.mxu1 }
 0x460   : > { %v4871_v9 = vpop.f32.mrf.mxu1 }
 0x462   : > { %v3524_v17 = vpop.f32.mrf.mxu1 }
 0x464   : > { %v1686_v16 = vpop.f32.mrf.mxu1 }
 0x466   : > { %v3527_v1 = vpop.f32.mrf.mxu1 }
 0x468   : > { %v1696_v10 = vpop.f32.mrf.mxu1 }
 0x472   : > { %v1771_v29 = vpop.f32.mrf.mxu1 }
 0x473   : > { %v1772_v61 = vadd.f32 %v1771_v29, %v1686_v16 }
 0x474   : > { %v1773_v60 = vpop.f32.mrf.mxu1 }
 0x475   : > { %v1790_v56 = vmul.f32 %v3746_v22, %v1772_v61 }
 0x476   : > { %v1776_v27 = vpop.f32.mrf.mxu1 }
 0x477   : > { %v1777_v28 = vadd.f32 %v3524_v17, %v1776_v27  ;;  %1794 = vxpose.xlu1.b32.start [1/4] (short) (narrow) %v1790_v56, 32  ;;  %v2157_v17 = vmax.f32 %v5299_v58, %v4516_v48 }
 0x478   : > { %v1778_v55 = vpop.f32.mrf.mxu1 }
 0x479   : > { %v1791_v21 = vmul.f32 %v3748_v59, %v1777_v28 }
 0x47a   : > { %v1781_v0 = vpop.f32.mrf.mxu1 }
 0x47b   : > { %v1782_v32 = vadd.f32 %v1781_v0, %v1696_v10  ;;  %1795 = vxpose.xlu1.b32.cont [2/4] (short) (narrow) %v1791_v21, 32  ;;  %v2153_v10 = vpop.xlane.xlu0 %2152 }
 0x47c   : > { %v1783_v12 = vpop.f32.mrf.mxu1 }
 0x47d   : > { %v1792_v7 = vmul.f32 %v3750_v19, %v1782_v32 }
 0x47e   : > { %v1786_v11 = vpop.f32.mrf.mxu1 }
 0x47f   : > { %v1787_v36 = vadd.f32 %v3527_v1, %v1786_v11  ;;  %1796 = vxpose.xlu1.b32.cont [3/4] (short) (narrow) %v1792_v7, 32  ;;  %v2165_v29 = vpop.xlane.xlu0 %2164 }
 0x480   : > { %v1788_v39 = vpop.f32.mrf.mxu1  ;;  %v2173_v60 = vmax.f32 %v2153_v10, %v2165_v29 }
 0x481   : > { %v1793_v53 = vmul.f32 %v3752_v46, %v1787_v36 }
 0x482   : > { %v2178_v0 = vsub.f32 %v5296_v51, %v2173_v60  ;;  %v2179_v7 = vsub.f32 %v5295_v6, %v2173_v60  ;;  %v2201_v33 = vsub.f32 %v4797_v15, %v2173_v60 }
 0x483   : > { %1797 = vxpose.xlu1.b32.end [4/4] (short) (narrow) %v1793_v53, 32  ;;  %v4921_v61 = vpop.permute.xlu0 %1928 }
 0x484   : > { %v2188_v39 = vmul.f32 1.442695, %v2178_v0  ;;  %v2190_v53 = vmul.f32 1.442695, %v2179_v7  ;;  %v2206_v49 = vmul.f32 1.442695, %v2201_v33  ;;  %v2727_v7 = vmax.f32 %v4546_v8, %v4548_v3 }
 0x485   : > { %v5300_v0 = vld [vmem:[#allocation17_spill] sm:$0xff] }
 0x487   : > { %v2156_v55 = vpop.xlane.xlu0 %2155 }
 0x4aa   : > { %2161 = vmax.xlane.f32.xlu1 %v2160_v42 }
 0x4ae   : > { %2167 = vmax.xlane.f32.xlu1 %v2166_v43 }
 0x4b2   : > { %2158 = vmax.xlane.f32.xlu1 %v2157_v17 }
 0x4b6   : > { %2170 = vmax.xlane.f32.xlu1 %v2169_v23 }
 0x4f3   : > { %v1810_v16 = vpop.trf.xlu1 }
 0x4f4   : > { %3429 = vmatmul.mubr.msk.f32.vlgmr.msra.gmra.mxu1 %vm1326_vm6, %v1810_v16 }
 0x4f5   : > { %1908 = vmatprep.mubr.f32.mxu1 %v5290_v44 }
 0x4f7   : > { %v1811_v63 = vpop.trf.xlu1 }
 0x4f8   : > { %3430 = vmatmul.mubr.msk.f32.gmra.mxu1 %vm1326_vm6, %v1811_v63 }
 0x4f9   : > { %1914 = vmatprep.mubr.f32.mxu1 %v5290_v44 }
 0x4fb   : > { %v1812_v40 = vpop.trf.xlu1 }
 0x4fc   : > { %3431 = vmatmul.mubr.msk.f32.gmra.mxu1 %vm1326_vm6, %v1812_v40 }
 0x4fd   : > { %1920 = vmatprep.mubr.f32.mxu1 %v5290_v44 }
 0x4ff   : > { %v1813_v1 = vpop.trf.xlu1 }
 0x500   : > { %3432 = vmatmul.mubr.msk.f32.gmra.mxu1 %vm1326_vm6, %v1813_v1 }
 0x501   : > { %1996 = vmatprep.mubr.f32.mxu1 %v5290_v44 }
 0x533   : > { %v2162_v22 = vpop.xlane.xlu1 %2161 }
 0x534   : > { %v2172_v56 = vmax.f32 %v2150_v35, %v2162_v22 }
 0x536   : > { %v2176_v27 = vsub.f32 %v5294_v54, %v2172_v56  ;;  %v2177_v28 = vsub.f32 %v5293_v37, %v2172_v56  ;;  %v2200_v59 = vsub.f32 %v903_v13, %v2172_v56 }
 0x537   : > { %v2168_v21 = vpop.xlane.xlu1 %2167 }
 0x538   : > { %v2184_v32 = vmul.f32 1.442695, %v2176_v27  ;;  %v2186_v19 = vmul.f32 1.442695, %v2177_v28  ;;  %v2174_v12 = vmax.f32 %v2156_v55, %v2168_v21  ;;  %v2204_v11 = vmul.f32 1.442695, %v2200_v59 }
 0x53a   : > { %3753 = vpow2.f32 %v2184_v32  ;;  %v2180_v36 = vsub.f32 %v5298_v4, %v2174_v12  ;;  %v2181_v46 = vsub.f32 %v5297_v5, %v2174_v12  ;;  %v2202_v4 = vsub.f32 %v4900_v24, %v2174_v12 }
 0x53b   : > { %3755 = vpow2.f32 %v2186_v19  ;;  %v2159_v54 = vpop.xlane.xlu1 %2158  ;;  %v2724_v32 = vmax.f32 %v5300_v0, %v4544_v57  ;;  %v4979_v19 = vld [vmem:[%s5238_s3 + $0x60] sm:$0xff] }
 0x53c   : > { %v2192_v37 = vmul.f32 1.442695, %v2180_v36  ;;  %v2194_v47 = vmul.f32 1.442695, %v2181_v46  ;;  %3757 = vpow2.f32 %v2204_v11  ;;  %v2208_v43 = vmul.f32 1.442695, %v2202_v4 }
 0x53d   : > { %v2736_v12 = vsel %vm1011_vm5, %v4979_v19, -inf  ;;  %v4988_v11 = vld [vmem:[%s5238_s3 + $0x68] sm:$0xff]  ;;  %v2730_v46 = vmax.f32 %v4562_v38, %v4564_v45 }
 0x53e   : > { %3759 = vpow2.f32 %v2192_v37  ;;  %v2739_v36 = vsel %vm1011_vm5, %v4988_v11, -inf  ;;  %v2733_v37 = vmax.f32 %v4578_v31, %v4580_v20 }
 0x53f   : > { %3761 = vpow2.f32 %v2194_v47  ;;  %v2171_v51 = vpop.xlane.xlu1 %2170  ;;  %v5006_v47 = vld [vmem:[%s5238_s3 + $0x78] sm:$0xff] }
 0x540   : > { %3763 = vpow2.f32 %v2188_v39  ;;  %v2175_v6 = vmax.f32 %v2159_v54, %v2171_v51  ;;  %v4997_v54 = vld [vmem:[%s5238_s3 + $0x70] sm:$0xff]  ;;  %v2745_v33 = vsel %vm1011_vm5, %v5006_v47, -inf  ;;  %v393_v51 = vld [vmem:[%s5237_s2 + $0x168] sm:$0xff] }
 0x541   : > { %3765 = vpow2.f32 %v2190_v53  ;;  %v2742_v39 = vsel %vm1011_vm5, %v4997_v54, -inf  ;;  %v392_v53 = vld [vmem:[%s5237_s2 + $0x160] sm:$0xff] }
 0x542   : > { %v2182_v5 = vsub.f32 %v5299_v58, %v2175_v6  ;;  %v2183_v52 = vsub.f32 %v4516_v48, %v2175_v6  ;;  %3767 = vpow2.f32 %v2206_v49  ;;  %v2203_v15 = vsub.f32 %v4909_v50, %v2175_v6  ;;  %3405 = vmatmul.mubr.msk.f32.gmra.mxu0 %vm396_vm4, %v392_v53  ;;  %v394_v6 = vld [vmem:[%s5237_s2 + $0x170] sm:$0xff]  ;;  %v395_v49 = vld [vmem:[%s5237_s2 + $0x178] sm:$0xff] }
 0x543   : > { %875 = vmatprep.mubr.f32.mxu0 %v5290_v44 }
 0x544   : > { %v2196_v13 = vmul.f32 1.442695, %v2182_v5  ;;  %v2198_v42 = vmul.f32 1.442695, %v2183_v52  ;;  %v2210_v58 = vmul.f32 1.442695, %v2203_v15 }
 0x546   : > { %3769 = vpow2.f32 %v2196_v13  ;;  %3406 = vmatmul.mubr.msk.f32.gmra.mxu0 %vm396_vm4, %v393_v51  ;;  %v5302_v51 = vld [vmem:[#allocation22_spill] sm:$0xff] }
 0x547   : > { %v4934_v17 = vpop.eup %3753  ;;  %3771 = vpow2.f32 %v2198_v42  ;;  %881 = vmatprep.mubr.f32.mxu0 %v5290_v44 }
 0x548   : > { %v4936_v23 = vpop.eup %3755  ;;  %3773 = vpow2.f32 %v2208_v43 }
 0x549   : > { %v2212_v16 = vadd.f32 %v4936_v23, %v4934_v17  ;;  %v4940_v24 = vpop.eup %3757  ;;  %3775 = vpow2.f32 %v2210_v58  ;;  %v847_v58 = vpop.f32.mrf.mxu0 }
 0x54a   : > { %v2224_v35 = vsel %vm1011_vm5, %v4940_v24, 0.0  ;;  %3407 = vmatmul.mubr.msk.f32.gmra.mxu0 %vm396_vm4, %v394_v6  ;;  %v5303_v6 = vld [vmem:[#allocation19_spill] sm:$0xff] }
 0x54b   : > { %v4942_v48 = vpop.eup %3759  ;;  %2213 = vadd.xlane.f32.xlu1 %v2212_v16  ;;  %887 = vmatprep.mubr.f32.mxu0 %v5290_v44 }
 0x54c   : > { %v4944_v63 = vpop.eup %3761 }
 0x54d   : > { %v4946_v40 = vpop.eup %3763  ;;  %v2218_v50 = vadd.f32 %v4944_v63, %v4942_v48 }
 0x54e   : > { %v4950_v1 = vpop.eup %3765  ;;  %3408 = vmatmul.mubr.msk.f32.gmra.mxu0 %vm396_vm4, %v395_v49 }
 0x54f   : > { %2225 = vadd.xlane.f32.xlu1 %v2224_v35  ;;  %2219 = vadd.xlane.f32.xlu0 %v2218_v50  ;;  %v2215_v10 = vadd.f32 %v4950_v1, %v4946_v40  ;;  %v4956_v29 = vpop.eup %3767  ;;  %v849_v50 = vpop.f32.mrf.mxu0 }
 0x550   : > { %v2227_v27 = vsel %vm1011_vm5, %v4956_v29, 0.0 }
 0x551   : > { %v853_v35 = vpop.f32.mrf.mxu0 }
 0x553   : > { %v4958_v22 = vpop.eup %3769  ;;  %2216 = vadd.xlane.f32.xlu1 %v2215_v10  ;;  %v855_v10 = vpop.f32.mrf.mxu0 }
 0x554   : > { %v4960_v60 = vpop.eup %3771 }
 0x555   : > { %v2221_v56 = vadd.f32 %v4960_v60, %v4958_v22  ;;  %v4966_v28 = vpop.eup %3773 }
 0x556   : > { %v2230_v59 = vsel %vm1011_vm5, %v4966_v28, 0.0  ;;  %v4970_v55 = vpop.eup %3775 }
 0x557   : > { %2228 = vadd.xlane.f32.xlu1 %v2227_v27  ;;  %2222 = vadd.xlane.f32.xlu0 %v2221_v56  ;;  %v2233_v21 = vsel %vm1011_vm5, %v4970_v55, 0.0  ;;  %v922_v56 = vld [vmem:[%s5239_s4 + $0x58] sm:$0xff] }
 0x55b   : > { %2231 = vadd.xlane.f32.xlu1 %v2230_v59 }
 0x55f   : > { %2234 = vadd.xlane.f32.xlu1 %v2233_v21 }
 0x563   : > { %2725 = vmax.xlane.f32.xlu1 %v2724_v32 }
 0x567   : > { %2737 = vmax.xlane.f32.xlu1 %v2736_v12 }
 0x56b   : > { %2728 = vmax.xlane.f32.xlu1 %v2727_v7 }
 0x56f   : > { %2740 = vmax.xlane.f32.xlu1 %v2739_v36 }
 0x573   : > { %2731 = vmax.xlane.f32.xlu1 %v2730_v46 }
 0x577   : > { %2743 = vmax.xlane.f32.xlu1 %v2742_v39 }
 0x57b   : > { %2734 = vmax.xlane.f32.xlu1 %v2733_v37 }
 0x57f   : > { %2746 = vmax.xlane.f32.xlu1 %v2745_v33 }
 0x590   : > { %2575 = vrot.lane.b32.xlu1 %v4804_v18, %s3890_s23 }
 0x5b4   : > { %v1904_v4 = vpop.f32.mrf.mxu1 }
 0x5b6   : > { %v1906_v5 = vpop.f32.mrf.mxu1 }
 0x5b8   : > { %v1910_v52 = vpop.f32.mrf.mxu1 }
 0x5ba   : > { %v1912_v13 = vpop.f32.mrf.mxu1 }
 0x5bc   : > { %v1916_v42 = vpop.f32.mrf.mxu1 }
 0x5be   : > { %v1918_v43 = vpop.f32.mrf.mxu1 }
 0x5c0   : > { %v1922_v15 = vpop.f32.mrf.mxu1 }
 0x5c2   : > { %v1924_v16 = vpop.f32.mrf.mxu1 }
 0x5c3   : > { %1956 = vmatprep.subr.mxu1 %v1924_v16 }
 0x5c4   : > { %1957 = vmatpush1.msra.mxu1 %v1922_v15 }
 0x5c5   : > { %1958 = vmatprep.subr.mxu1 %v1918_v43 }
 0x5c6   : > { %1959 = vmatpush1.msra.mxu1 %v1916_v42 }
 0x5c7   : > { %1960 = vmatprep.subr.mxu1 %v1912_v13 }
 0x5c8   : > { %1961 = vmatpush1.msra.mxu1 %v1910_v52 }
 0x5c9   : > { %1962 = vmatprep.subr.mxu1 %v1906_v5 }
 0x5ca   : > { %1963 = vmatpush1.msra.mxu1 %v1904_v4 }
 0x5cb   : > { %3433 = vmatmul.mubr.msk.f32.vlgmr.msra.gmra.mxu1 %vm1326_vm6, %v4921_v61  ;;  %2029 = vmatprep.subr.mxu1 %v4871_v9  ;;  %v919_v61 = vld [vmem:[%s5239_s4 + $0x40] sm:$0xff] }
 0x5cc   : > { %2030 = vmatpush1.msra.mxu1 %v4869_v2  ;;  %2069 = vmatprep.mubr.f32.mxu1 %v5290_v44  ;;  %v921_v2 = vld [vmem:[%s5239_s4 + $0x50] sm:$0xff] }
 0x5cd   : > { %2031 = vmatprep.subr.mxu1 %v4867_v41  ;;  %v859_v41 = vpop.f32.mrf.mxu0 }
 0x5ce   : > { %2032 = vmatpush1.msra.mxu1 %v4865_v34 }
 0x5cf   : > { %2033 = vmatprep.subr.mxu1 %v4863_v62 }
 0x5d0   : > { %2034 = vmatpush1.msra.mxu1 %v4861_v30 }
 0x5d1   : > { %2035 = vmatprep.subr.mxu1 %v4859_v14  ;;  %v861_v14 = vpop.f32.mrf.mxu0 }
 0x5d2   : > { %2036 = vmatpush1.msra.mxu1 %v4857_v26  ;;  %v920_v26 = vld [vmem:[%s5239_s4 + $0x48] sm:$0xff] }
 0x5d3   : > { %3434 = vmatmul.mubr.msk.f32.vlgmr.msra.gmra.mxu1 %vm1326_vm6, %v4804_v18  ;;  %3528 = vmatprep.subr.msk.mxu1 %vm1011_vm5, %v922_v56  ;;  %v865_v9 = vpop.f32.mrf.mxu0 }
 0x5d4   : > { %v2214_v62 = vpop.xlane.xlu1 %2213  ;;  %3529 = vmatpush3.xpose.msk.msra.mxu1 %vm1011_vm5, %v922_v56  ;;  %3536 = vmatprep.mubr.msk.f32.mxu1 %vm1011_vm5, %v4940_v24 }
 0x5d5   : > { %3530 = vmatprep.subr.msk.mxu1 %vm1011_vm5, %v921_v2  ;;  %v867_v27 = vpop.f32.mrf.mxu0 }
 0x5d8   : > { %v2226_v30 = vpop.xlane.xlu1 %2225  ;;  %3531 = vmatpush3.xpose.msk.msra.mxu1 %vm1011_vm5, %v921_v2 }
 0x5d9   : > { %v5058_v34 = vadd.f32 %v2226_v30, %v2214_v62  ;;  %3532 = vmatprep.subr.msk.mxu1 %vm1011_vm5, %v920_v26 }
 0x5dc   : > { %v2217_v24 = vpop.xlane.xlu1 %2216  ;;  %3533 = vmatpush3.xpose.msk.msra.mxu1 %vm1011_vm5, %v920_v26 }
 0x5dd   : > { %3534 = vmatprep.subr.msk.mxu1 %vm1011_vm5, %v919_v61 }
 0x5e0   : > { %v2229_v59 = vpop.xlane.xlu1 %2228  ;;  %3535 = vmatpush3.xpose.msk.msra.mxu1 %vm1011_vm5, %v919_v61  ;;  %v5311_v61 = vld [vmem:[#allocation30_spill] sm:$0xff] }
 0x5e1   : > { %v5067_v21 = vadd.f32 %v2229_v59, %v2217_v24  ;;  %2377 = vmatprep.subr.mxu1 %v867_v27  ;;  %v5312_v59 = vld [vmem:[#allocation27_spill] sm:$0xff] }
 0x5e3   : > { %3537 = vmatmul.mubr.msk.f32.vlgmr.msra.gmra.mxu1 %vm1011_vm5, %v4956_v29 }
 0x5e4   : > { %v5071_v32 = vpop.xlane.xlu1 %2231  ;;  %3539 = vmatprep.mubr.msk.f32.mxu1 %vm1011_vm5, %v4966_v28  ;;  %2378 = vmatpush1.xpose.msra.mxu1 %v865_v9 }
 0x5e5   : > { %2379 = vmatprep.subr.mxu1 %v861_v14 }
 0x5e7   : > { %3540 = vmatmul.mubr.msk.f32.gmra.mxu1 %vm1011_vm5, %v4970_v55 }
 0x5e8   : > { %v5077_v12 = vpop.xlane.xlu1 %2234  ;;  %2380 = vmatpush1.xpose.msra.mxu1 %v859_v41  ;;  %2417 = vmatprep.mubr.f32.mxu1 %v4936_v23  ;;  %v5301_v23 = vld [vmem:[#allocation18_spill] sm:$0xff] }
 0x5e9   : > { %2381 = vmatprep.subr.mxu1 %v855_v10 }
 0x5ec   : > { %v2726_v7 = vpop.xlane.xlu1 %2725  ;;  %2382 = vmatpush1.xpose.msra.mxu1 %v853_v35 }
 0x5ed   : > { %2383 = vmatprep.subr.mxu1 %v849_v50 }
 0x5f0   : > { %v2738_v29 = vpop.xlane.xlu1 %2737  ;;  %2384 = vmatpush1.xpose.msra.mxu1 %v847_v58 }
 0x5f1   : > { %v2748_v36 = vmax.f32 %v2726_v7, %v2738_v29  ;;  %2510 = vmatprep.subr.mxu1 %v4567_v25  ;;  %v5313_v29 = vld [vmem:[#allocation31_spill] sm:$0xff] }
 0x5f3   : > { %v2752_v28 = vsub.f32 %v5300_v0, %v2748_v36  ;;  %v2753_v46 = vsub.f32 %v4544_v57, %v2748_v36  ;;  %v2776_v55 = vsub.f32 %v4979_v19, %v2748_v36  ;;  %2418 = vmatmul.mubr.f32.vlgmr.msra.gmra.mxu1 %v4934_v17  ;;  %v5304_v57 = vld [vmem:[#allocation23_spill] sm:$0xff]  ;;  %v5305_v17 = vld [vmem:[#allocation20_spill] sm:$0xff]  ;;  %v5307_v19 = vld [vmem:[#allocation21_spill] sm:$0xff] }
 0x5f4   : > { %v2729_v39 = vpop.xlane.xlu1 %2728  ;;  %2422 = vmatprep.mubr.f32.mxu1 %v4950_v1  ;;  %2511 = vmatpush1.msra.mxu1 %v5301_v23  ;;  %v5306_v0 = vld [vmem:[#allocation24_spill] sm:$0xff] }
 0x5f5   : > { %v2760_v37 = vmul.f32 1.442695, %v2752_v28  ;;  %v2762_v53 = vmul.f32 1.442695, %v2753_v46  ;;  %v2780_v33 = vmul.f32 1.442695, %v2776_v55  ;;  %2512 = vmatprep.subr.mxu1 %v5302_v51 }
 0x5f6   : > { %2513 = vmatpush1.msra.mxu1 %v5303_v6  ;;  %v5314_v28 = vld [vmem:[#allocation28_spill] sm:$0xff] }
 0x5f7   : > { %3777 = vpow2.f32 %v2760_v37  ;;  %2423 = vmatmul.mubr.f32.gmra.mxu1 %v4946_v40  ;;  %2514 = vmatprep.subr.mxu1 %v5304_v57 }
 0x5f8   : > { %3779 = vpow2.f32 %v2762_v53  ;;  %v2741_v25 = vpop.xlane.xlu1 %2740  ;;  %2427 = vmatprep.mubr.f32.mxu1 %v4944_v63  ;;  %2515 = vmatpush1.msra.mxu1 %v5305_v17 }
 0x5f9   : > { %3781 = vpow2.f32 %v2780_v33  ;;  %v2749_v1 = vmax.f32 %v2729_v39, %v2741_v25  ;;  %2516 = vmatprep.subr.mxu1 %v5306_v0 }
 0x5fa   : > { %2517 = vmatpush1.msra.mxu1 %v5307_v19  ;;  %v2220_v19 = vpop.xlane.xlu0 %2219 }
 0x5fb   : > { %v2754_v49 = vsub.f32 %v4546_v8, %v2749_v1  ;;  %v2755_v4 = vsub.f32 %v4548_v3, %v2749_v1  ;;  %v2777_v40 = vsub.f32 %v4988_v11, %v2749_v1  ;;  %2428 = vmatmul.mubr.f32.gmra.mxu1 %v4942_v48 }
 0x5fc   : > { %v2732_v5 = vpop.xlane.xlu1 %2731  ;;  %2432 = vmatprep.mubr.f32.mxu1 %v4960_v60 }
 0x5fd   : > { %v2764_v63 = vmul.f32 1.442695, %v2754_v49  ;;  %v2766_v52 = vmul.f32 1.442695, %v2755_v4  ;;  %v2782_v13 = vmul.f32 1.442695, %v2777_v40  ;;  %v2238_v49 = vadd.f32 %v5071_v32, %v2220_v19 }
 0x5fe   : > { %v2223_v40 = vpop.xlane.xlu0 %2222 }
 0x5ff   : > { %3783 = vpow2.f32 %v2764_v63  ;;  %2433 = vmatmul.mubr.f32.gmra.mxu1 %v4958_v22 }
 0x600   : > { %3785 = vpow2.f32 %v2766_v52  ;;  %v2744_v42 = vpop.xlane.xlu1 %2743  ;;  %2550 = vmatprep.mubr.f32.mxu1 %v5290_v44 }
 0x601   : > { %3787 = vpow2.f32 %v2782_v13  ;;  %v2750_v8 = vmax.f32 %v2732_v5, %v2744_v42  ;;  %v2239_v5 = vadd.f32 %v5077_v12, %v2223_v40 }
 0x603   : > { %v2756_v3 = vsub.f32 %v4562_v38, %v2750_v8  ;;  %v2757_v11 = vsub.f32 %v4564_v45, %v2750_v8  ;;  %v2778_v48 = vsub.f32 %v4997_v54, %v2750_v8 }
 0x604   : > { %v5105_v43 = vpop.eup %3777  ;;  %v2735_v60 = vpop.xlane.xlu1 %2734 }
 0x605   : > { %v5107_v15 = vpop.eup %3779  ;;  %v2768_v16 = vmul.f32 1.442695, %v2756_v3  ;;  %v2770_v58 = vmul.f32 1.442695, %v2757_v11  ;;  %v2784_v22 = vmul.f32 1.442695, %v2778_v48 }
 0x606   : > { %v5109_v50 = vpop.eup %3781  ;;  %v2788_v35 = vadd.f32 %v5107_v15, %v5105_v43 }
 0x607   : > { %3789 = vpow2.f32 %v2768_v16  ;;  %3550 = vmatprep.mubr.msk.f32.mxu0 %vm1011_vm5, %v5109_v50 }
 0x608   : > { %3791 = vpow2.f32 %v2770_v58  ;;  %2789 = vadd.xlane.f32.xlu1 %v2788_v35  ;;  %v2747_v38 = vpop.xlane.xlu1 %2746 }
 0x609   : > { %3793 = vpow2.f32 %v2784_v22  ;;  %v2751_v45 = vmax.f32 %v2735_v60, %v2747_v38 }
 0x60b   : > { %v2758_v54 = vsub.f32 %v4578_v31, %v2751_v45  ;;  %v2759_v10 = vsub.f32 %v4580_v20, %v2751_v45  ;;  %v2779_v56 = vsub.f32 %v5006_v47, %v2751_v45  ;;  %v5308_v31 = vld [vmem:[#allocation25_spill] sm:$0xff]  ;;  %v5310_v47 = vld [vmem:[#allocation26_spill] sm:$0xff] }
 0x60c   : > { %v5118_v2 = vpop.eup %3783  ;;  %v5309_v20 = vld [vmem:[#allocation29_spill] sm:$0xff] }
 0x60d   : > { %v5120_v41 = vpop.eup %3785  ;;  %v2772_v62 = vmul.f32 1.442695, %v2758_v54  ;;  %v2774_v26 = vmul.f32 1.442695, %v2759_v10  ;;  %v2786_v14 = vmul.f32 1.442695, %v2779_v56 }
 0x60e   : > { %v3788_v30 = vpop.eup %3787  ;;  %v2791_v9 = vadd.f32 %v5120_v41, %v5118_v2  ;;  %v2800_v56 = vsel %vm1011_vm5, %v5109_v50, 0.0 }
 0x60f   : > { %3795 = vpow2.f32 %v2772_v62  ;;  %3551 = vmatmul.mubr.msk.f32.vlgmr.msra.gmra.mxu0 %vm1011_vm5, %v3788_v30  ;;  %v2803_v24 = vsel %vm1011_vm5, %v3788_v30, 0.0 }
 0x610   : > { %3797 = vpow2.f32 %v2774_v26  ;;  %3087 = vmatpush1.msra.mxu0 %v5308_v31  ;;  %2792 = vadd.xlane.f32.xlu1 %v2791_v9  ;;  %v3228_v26 = vld [vmem:[%s5241_s6] sm:$0xff]  ;;  %v871_v31 = vpop.f32.mrf.mxu0 }
 0x611   : > { %3799 = vpow2.f32 %v2786_v14  ;;  %3088 = vmatprep.subr.mxu0 %v5309_v20  ;;  %v3270_v14 = vld [vmem:[%s5242_s7] sm:$0xff] }
 0x612   : > { %3089 = vmatpush1.msra.mxu0 %v5310_v47  ;;  %3801 = vrcp.f32 %v5058_v34  ;;  %v873_v20 = vpop.f32.mrf.mxu0 }
 0x613   : > { %3090 = vmatprep.subr.mxu0 %v5311_v61  ;;  %3803 = vrcp.f32 %v5067_v21 }
 0x614   : > { %v5130_v27 = vpop.eup %3789  ;;  %3091 = vmatpush1.msra.mxu0 %v5312_v59  ;;  %2804 = vadd.xlane.f32.xlu1 %v2803_v24  ;;  %3805 = vrcp.f32 %v2238_v49  ;;  %v877_v61 = vpop.f32.mrf.mxu0 }
 0x615   : > { %v5133_v7 = vpop.eup %3791  ;;  %3092 = vmatprep.subr.mxu0 %v5313_v29  ;;  %3807 = vrcp.f32 %v2239_v5 }
 0x616   : > { %v3794_v36 = vpop.eup %3793  ;;  %3093 = vmatpush1.msra.mxu0 %v5314_v28  ;;  %v2794_v46 = vadd.f32 %v5133_v7, %v5130_v27  ;;  %v879_v29 = vpop.f32.mrf.mxu0 }
 0x617   : > { %3553 = vmatprep.mubr.msk.f32.mxu0 %vm1011_vm5, %v3794_v36  ;;  %v2806_v55 = vsel %vm1011_vm5, %v3794_v36, 0.0 }
 0x618   : > { %2795 = vadd.xlane.f32.xlu1 %v2794_v46  ;;  %v883_v46 = vpop.f32.mrf.mxu0 }
 0x61c   : > { %v5141_v39 = vpop.eup %3795  ;;  %2807 = vadd.xlane.f32.xlu1 %v2806_v55 }
 0x61d   : > { %v5143_v23 = vpop.eup %3797 }
 0x61e   : > { %v3800_v37 = vpop.eup %3799  ;;  %v2797_v53 = vadd.f32 %v5143_v23, %v5141_v39 }
 0x61f   : > { %3554 = vmatmul.mubr.msk.f32.gmra.mxu0 %vm1011_vm5, %v3800_v37  ;;  %v3802_v42 = vpop.eup %3801  ;;  %v2809_v62 = vsel %vm1011_vm5, %v3800_v37, 0.0 }
 0x620   : > { %2798 = vadd.xlane.f32.xlu1 %v2797_v53  ;;  %3126 = vmatprep.mubr.f32.mxu0 %v5290_v44  ;;  %v3804_v48 = vpop.eup %3803  ;;  %v885_v53 = vpop.f32.mrf.mxu0 }
 0x621   : > { %v3806_v58 = vpop.eup %3805 }
 0x622   : > { %v3808_v45 = vpop.eup %3807 }
 0x68b   : > { %v1998_v33 = vpop.f32.mrf.mxu1 }
 0x68d   : > { %v2000_v51 = vpop.f32.mrf.mxu1 }
 0x693   : > { %v2071_v6 = vpop.f32.mrf.mxu1 }
 0x694   : > { %v5149_v57 = vadd.f32 %v2071_v6, %v1998_v33  ;;  %v2576_v6 = vpop.permute.xlu1 %2575 }
 0x695   : > { %v2073_v25 = vpop.f32.mrf.mxu1 }
 0x696   : > { %v5151_v17 = vadd.f32 %v2073_v25, %v2000_v51  ;;  %v889_v51 = vpop.f32.mrf.mxu0 }
 0x698   : > { %v891_v25 = vpop.f32.mrf.mxu0 }
 0x6a3   : > { %v3538_v1 = vpop.f32.mrf.mxu1 }
 0x6a5   : > { %v2334_v0 = vpop.f32.mrf.mxu1 }
 0x6a7   : > { %v3541_v4 = vpop.f32.mrf.mxu1 }
 0x6a9   : > { %v2344_v63 = vpop.f32.mrf.mxu1 }
 0x6b3   : > { %v2419_v52 = vpop.f32.mrf.mxu1 }
 0x6b4   : > { %v2420_v13 = vadd.f32 %v2419_v52, %v2334_v0 }
 0x6b5   : > { %v2421_v8 = vpop.f32.mrf.mxu1 }
 0x6b6   : > { %v2438_v3 = vmul.f32 %v3802_v42, %v2420_v13 }
 0x6b7   : > { %v2424_v11 = vpop.f32.mrf.mxu1 }
 0x6b8   : > { %v2425_v34 = vadd.f32 %v3538_v1, %v2424_v11  ;;  %2442 = vxpose.xlu0.b32.start [1/4] (short) (narrow) %v2438_v3, 32 }
 0x6b9   : > { %v2426_v60 = vpop.f32.mrf.mxu1 }
 0x6ba   : > { %v2439_v21 = vmul.f32 %v3804_v48, %v2425_v34 }
 0x6bb   : > { %v2429_v16 = vpop.f32.mrf.mxu1 }
 0x6bc   : > { %v2430_v32 = vadd.f32 %v2429_v16, %v2344_v63  ;;  %2443 = vxpose.xlu0.b32.cont [2/4] (short) (narrow) %v2439_v21, 32 }
 0x6bd   : > { %v2431_v22 = vpop.f32.mrf.mxu1 }
 0x6be   : > { %v2440_v35 = vmul.f32 %v3806_v58, %v2430_v32 }
 0x6bf   : > { %v2434_v12 = vpop.f32.mrf.mxu1 }
 0x6c0   : > { %v2435_v38 = vadd.f32 %v3541_v4, %v2434_v12  ;;  %2444 = vxpose.xlu0.b32.cont [3/4] (short) (narrow) %v2440_v35, 32 }
 0x6c1   : > { %v2436_v54 = vpop.f32.mrf.mxu1 }
 0x6c2   : > { %v2441_v10 = vmul.f32 %v3808_v45, %v2435_v38 }
 0x6c4   : > { %2445 = vxpose.xlu0.b32.end [4/4] (short) (narrow) %v2441_v10, 32 }
 0x6cf   : > { %v3552_v63 = vpop.f32.mrf.mxu0 }
 0x6d1   : > { %v2910_v13 = vpop.f32.mrf.mxu0 }
 0x6df   : > { %v3555_v34 = vpop.f32.mrf.mxu0 }
 0x6e1   : > { %v2920_v32 = vpop.f32.mrf.mxu0 }
 0x6f1   : > { %2801 = vadd.xlane.f32.xlu0 %v2800_v56 }
 0x6f5   : > { %2810 = vadd.xlane.f32.xlu0 %v2809_v62 }
 0x70b   : > { %3151 = vrot.lane.b32.xlu0 %v4804_v18, %s3891_s19  ;;  %s3281_s19 = scalar_lea.sflag [#allocation3], %s296_s24 }
 0x70f   : > { %3231 = vperm.xlu0 %3600, %v3228_v26  }
 0x713   : > { %3273 = vperm.xlu0 %3600, %v3270_v14  }
 0x734   : > { %v2458_v30 = vpop.trf.xlu0 }
 0x735   : > { %3443 = vmatmul.mubr.msk.f32.vlgmr.msra.gmra.mxu1 %vm1326_vm6, %v2458_v30 }
 0x736   : > { %2556 = vmatprep.mubr.f32.mxu1 %v5290_v44 }
 0x738   : > { %v2459_v50 = vpop.trf.xlu0 }
 0x739   : > { %3444 = vmatmul.mubr.msk.f32.gmra.mxu1 %vm1326_vm6, %v2459_v50 }
 0x73a   : > { %2562 = vmatprep.mubr.f32.mxu1 %v5290_v44 }
 0x73c   : > { %v2460_v18 = vpop.trf.xlu0 }
 0x73d   : > { %3445 = vmatmul.mubr.msk.f32.gmra.mxu1 %vm1326_vm6, %v2460_v18 }
 0x73e   : > { %2568 = vmatprep.mubr.f32.mxu1 %v5290_v44 }
 0x740   : > { %v2461_v9 = vpop.trf.xlu0 }
 0x741   : > { %3446 = vmatmul.mubr.msk.f32.gmra.mxu1 %vm1326_vm6, %v2461_v9 }
 0x742   : > { %2643 = vmatprep.mubr.f32.mxu1 %v5290_v44 }
 0x77a   : > { %v2802_v19 = vpop.xlane.xlu0 %2801 }
 0x77e   : > { %v2811_v40 = vpop.xlane.xlu0 %2810 }
 0x7f5   : > { %v2552_v47 = vpop.f32.mrf.mxu1 }
 0x7f7   : > { %v2554_v24 = vpop.f32.mrf.mxu1 }
 0x7f9   : > { %v2558_v59 = vpop.f32.mrf.mxu1 }
 0x7fb   : > { %v2560_v36 = vpop.f32.mrf.mxu1 }
 0x7fd   : > { %v2564_v28 = vpop.f32.mrf.mxu1 }
 0x7ff   : > { %v2566_v55 = vpop.f32.mrf.mxu1 }
 0x801   : > { %v2570_v37 = vpop.f32.mrf.mxu1 }
 0x803   : > { %v2572_v33 = vpop.f32.mrf.mxu1 }
 0x804   : > { %2603 = vmatprep.subr.mxu1 %v2572_v33 }
 0x805   : > { %2604 = vmatpush1.msra.mxu1 %v2570_v37 }
 0x806   : > { %2605 = vmatprep.subr.mxu1 %v2566_v55 }
 0x807   : > { %2606 = vmatpush1.msra.mxu1 %v2564_v28 }
 0x808   : > { %2607 = vmatprep.subr.mxu1 %v2560_v36 }
 0x809   : > { %2608 = vmatpush1.msra.mxu1 %v2558_v59 }
 0x80a   : > { %2609 = vmatprep.subr.mxu1 %v2554_v24 }
 0x80b   : > { %2610 = vmatpush1.msra.mxu1 %v2552_v47 }
 0x80c   : > { %3447 = vmatmul.mubr.msk.f32.vlgmr.msra.gmra.mxu1 %vm1326_vm6, %v2576_v6  ;;  %2953 = vmatprep.subr.mxu1 %v891_v25 }
 0x80d   : > { %2954 = vmatpush1.xpose.msra.mxu1 %v889_v51  ;;  %2993 = vmatprep.mubr.f32.mxu1 %v5107_v15  ;;  %v2790_v15 = vpop.xlane.xlu1 %2789 }
 0x80e   : > { %2955 = vmatprep.subr.mxu1 %v885_v53  ;;  %v2812_v4 = vadd.f32 %v2802_v19, %v2790_v15 }
 0x810   : > { %3809 = vrcp.f32 %v2812_v4 }
 0x811   : > { %2956 = vmatpush1.xpose.msra.mxu1 %v883_v46  ;;  %v2793_v1 = vpop.xlane.xlu1 %2792 }
 0x812   : > { %2957 = vmatprep.subr.mxu1 %v879_v29  ;;  %v3152_v29 = vpop.permute.xlu0 %3151 }
 0x815   : > { %2958 = vmatpush1.xpose.msra.mxu1 %v877_v61  ;;  %v2805_v0 = vpop.xlane.xlu1 %2804 }
 0x816   : > { %2959 = vmatprep.subr.mxu1 %v873_v20  ;;  %v3232_v28 = vpop.permute.xlu0 %3231 }
 0x819   : > { %2960 = vmatpush1.xpose.msra.mxu1 %v871_v31  ;;  %v2796_v49 = vpop.xlane.xlu1 %2795 }
 0x81c   : > { %2994 = vmatmul.mubr.f32.vlgmr.msra.gmra.mxu1 %v5105_v43 }
 0x81d   : > { %2998 = vmatprep.mubr.f32.mxu1 %v5120_v41 }
 0x820   : > { %2999 = vmatmul.mubr.f32.gmra.mxu1 %v5118_v2 }
 0x821   : > { %3003 = vmatprep.mubr.f32.mxu1 %v5133_v7 }
 0x824   : > { %3004 = vmatmul.mubr.f32.gmra.mxu1 %v5130_v27  ;;  %v2813_v27 = vadd.f32 %v2805_v0, %v2793_v1 }
 0x825   : > { %3008 = vmatprep.mubr.f32.mxu1 %v5143_v23  ;;  %v2808_v23 = vpop.xlane.xlu1 %2807 }
 0x826   : > { %3811 = vrcp.f32 %v2813_v27 }
 0x828   : > { %3009 = vmatmul.mubr.f32.gmra.mxu1 %v5141_v39  ;;  %v2814_v39 = vadd.f32 %v2808_v23, %v2796_v49 }
 0x829   : > { %3219 = vmatprep.mubr.f32.mxu1 %v5290_v44  ;;  %v2799_v5 = vpop.xlane.xlu1 %2798 }
 0x82a   : > { %3813 = vrcp.f32 %v2814_v39  ;;  %v2815_v52 = vadd.f32 %v2811_v40, %v2799_v5 }
 0x82c   : > { %3815 = vrcp.f32 %v2815_v52 }
 0x8cc   : > { %v2645_v43 = vpop.f32.mrf.mxu1 }
 0x8cd   : > { %v5186_v41 = vadd.f32 %v2645_v43, %v5149_v57  ;;  %v3810_v57 = vpop.eup %3809 }
 0x8ce   : > { %v2647_v2 = vpop.f32.mrf.mxu1  ;;  %v3812_v60 = vpop.eup %3811 }
 0x8cf   : > { %v5189_v7 = vadd.f32 %v2647_v2, %v5151_v17  ;;  %v3814_v35 = vpop.eup %3813 }
 0x8d0   : > { %v3816_v10 = vpop.eup %3815 }
 0x8dc   : > { %v2995_v42 = vpop.f32.mrf.mxu1 }
 0x8dd   : > { %v2996_v8 = vadd.f32 %v2995_v42, %v2910_v13 }
 0x8de   : > { %v2997_v3 = vpop.f32.mrf.mxu1 }
 0x8df   : > { %v3014_v11 = vmul.f32 %v3810_v57, %v2996_v8 }
 0x8e0   : > { %v3000_v17 = vpop.f32.mrf.mxu1 }
 0x8e1   : > { %v3001_v48 = vadd.f32 %v3552_v63, %v3000_v17  ;;  %3018 = vxpose.xlu1.b32.start [1/4] (short) (narrow) %v3014_v11, 32  ;;  %v3274_v17 = vpop.permute.xlu0 %3273 }
 0x8e2   : > { %v3002_v21 = vpop.f32.mrf.mxu1 }
 0x8e3   : > { %v3015_v16 = vmul.f32 %v3812_v60, %v3001_v48 }
 0x8e4   : > { %v3005_v58 = vpop.f32.mrf.mxu1 }
 0x8e5   : > { %v3006_v22 = vadd.f32 %v3005_v58, %v2920_v32  ;;  %3019 = vxpose.xlu1.b32.cont [2/4] (short) (narrow) %v3015_v16, 32 }
 0x8e6   : > { %v3007_v12 = vpop.f32.mrf.mxu1 }
 0x8e7   : > { %v3016_v38 = vmul.f32 %v3814_v35, %v3006_v22 }
 0x8e8   : > { %v3010_v45 = vpop.f32.mrf.mxu1 }
 0x8e9   : > { %v3011_v54 = vadd.f32 %v3555_v34, %v3010_v45  ;;  %3020 = vxpose.xlu1.b32.cont [3/4] (short) (narrow) %v3016_v38, 32 }
 0x8ea   : > { %v3012_v56 = vpop.f32.mrf.mxu1 }
 0x8eb   : > { %v3017_v62 = vmul.f32 %v3816_v10, %v3011_v54 }
 0x8ed   : > { %3021 = vxpose.xlu1.b32.end [4/4] (short) (narrow) %v3017_v62, 32 }
 0x95d   : > { %v3034_v26 = vpop.trf.xlu1 }
 0x95e   : > { %3456 = vmatmul.mubr.msk.f32.vlgmr.msra.gmra.mxu0 %vm1326_vm6, %v3034_v26 }
 0x95f   : > { %3132 = vmatprep.mubr.f32.mxu0 %v5290_v44 }
 0x961   : > { %v3035_v14 = vpop.trf.xlu1 }
 0x962   : > { %3457 = vmatmul.mubr.msk.f32.gmra.mxu0 %vm1326_vm6, %v3035_v14 }
 0x963   : > { %3138 = vmatprep.mubr.f32.mxu0 %v5290_v44 }
 0x965   : > { %v3036_v30 = vpop.trf.xlu1 }
 0x966   : > { %3458 = vmatmul.mubr.msk.f32.gmra.mxu0 %vm1326_vm6, %v3036_v30 }
 0x967   : > { %3144 = vmatprep.mubr.f32.mxu0 %v5290_v44 }
 0x969   : > { %v3037_v50 = vpop.trf.xlu1 }
 0x96a   : > { %3459 = vmatmul.mubr.msk.f32.gmra.mxu0 %vm1326_vm6, %v3037_v50 }
 0xa1e   : > { %v3128_v18 = vpop.f32.mrf.mxu0 }
 0xa20   : > { %v3130_v9 = vpop.f32.mrf.mxu0 }
 0xa22   : > { %v3134_v31 = vpop.f32.mrf.mxu0 }
 0xa24   : > { %v3136_v20 = vpop.f32.mrf.mxu0 }
 0xa26   : > { %v3140_v47 = vpop.f32.mrf.mxu0 }
 0xa28   : > { %v3142_v61 = vpop.f32.mrf.mxu0 }
 0xa2a   : > { %v3146_v24 = vpop.f32.mrf.mxu0 }
 0xa2c   : > { %v3148_v59 = vpop.f32.mrf.mxu0 }
 0xa2d   : > { %3179 = vmatprep.subr.mxu1 %v3148_v59 }
 0xa2e   : > { %3180 = vmatpush1.msra.mxu1 %v3146_v24 }
 0xa2f   : > { %3181 = vmatprep.subr.mxu1 %v3142_v61 }
 0xa30   : > { %3182 = vmatpush1.msra.mxu1 %v3140_v47 }
 0xa31   : > { %3183 = vmatprep.subr.mxu1 %v3136_v20 }
 0xa32   : > { %3184 = vmatpush1.msra.mxu1 %v3134_v31 }
 0xa33   : > { %3185 = vmatprep.subr.mxu1 %v3130_v9 }
 0xa34   : > { %3186 = vmatpush1.msra.mxu1 %v3128_v18 }
 0xa35   : > { %3460 = vmatmul.mubr.msk.f32.vlgmr.msra.gmra.mxu1 %vm1326_vm6, %v3152_v29 }
 0xaf5   : > { %v3221_v44 = vpop.f32.mrf.mxu1 }
 0xaf6   : > { %v3226_v36 = vadd.f32 %v3221_v44, %v5186_v41 }
 0xaf7   : > { %v3223_v46 = vpop.f32.mrf.mxu1 }
 0xaf8   : > { %v3234_v55 = vadd.f32 %v3232_v28, %v3226_v36  ;;  %v3227_v37 = vadd.f32 %v3223_v46, %v5189_v7 }
 0xafa   : > { %v3236_v53 = vmul.f32 %v3234_v55, %v3234_v55  ;;  %v3235_v33 = vadd.f32 %v3232_v28, %v3227_v37 }
 0xafc   : > { %v3238_v51 = vrot.slane %v3236_v53, 4  ;;  %v3237_v6 = vmul.f32 %v3235_v33, %v3235_v33 }
 0xafe   : > { %v3239_v25 = vadd.f32 %v3238_v51, %v3236_v53  ;;  %v3244_v15 = vrot.slane %v3237_v6, 4 }
 0xb00   : > { %v3240_v1 = vrot.slane %v3239_v25, 2  ;;  %v3245_v0 = vadd.f32 %v3244_v15, %v3237_v6 }
 0xb02   : > { %v3241_v19 = vadd.f32 %v3240_v1, %v3239_v25  ;;  %v3246_v49 = vrot.slane %v3245_v0, 2 }
 0xb04   : > { %v3242_v43 = vrot.slane %v3241_v19, 1  ;;  %v3247_v4 = vadd.f32 %v3246_v49, %v3245_v0 }
 0xb06   : > { %v3243_v2 = vadd.f32 %v3242_v43, %v3241_v19  ;;  %v3248_v27 = vrot.slane %v3247_v4, 1 }
 0xb08   : > { %3817 = vrsqrt.f32 %v3243_v2  ;;  %v3249_v41 = vadd.f32 %v3248_v27, %v3247_v4  ;;  %vm3252_vm7 = vcmp.eq.f32.partialorder %v3243_v2, inf  ;;  %v3255_v7 = vand.u32 2147483648, %v3243_v2 }
 0xb09   : > { %vm3254_vm8 = vcmp.eq.f32.partialorder %v3243_v2, 0.0 }
 0xb0a   : > { %3819 = vrsqrt.f32 %v3249_v41  ;;  %vm3259_vm9 = vcmp.eq.f32.partialorder %v3249_v41, inf  ;;  %v3262_v42 = vand.u32 2147483648, %v3249_v41  ;;  %vm3261_vm10 = vcmp.eq.f32.partialorder %v3249_v41, 0.0 }
 0xb15   : > { %v3818_v23 = vpop.eup %3817 }
 0xb16   : > { %v3251_v39 = vmul.f32 %v3818_v23, %v3243_v2 }
 0xb17   : > { %v3820_v40 = vpop.eup %3819 }
 0xb18   : > { %v3253_v5 = vsel %vm3252_vm7, %v3243_v2, %v3251_v39  ;;  %v3258_v52 = vmul.f32 %v3820_v40, %v3249_v41 }
 0xb19   : > { %v3256_v63 = vsel %vm3254_vm8, %v3255_v7, %v3253_v5 }
 0xb1a   : > { %v3264_v13 = vmax.f32 %v3256_v63, 1e-12  ;;  %v3260_v8 = vsel %vm3259_vm9, %v3249_v41, %v3258_v52 }
 0xb1b   : > { %v3263_v57 = vsel %vm3261_vm10, %v3262_v42, %v3260_v8 }
 0xb1c   : > { %3821 = vrcp.f32 %v3264_v13  ;;  %v3265_v3 = vmax.f32 %v3263_v57, 1e-12 }
 0xb1e   : > { %3823 = vrcp.f32 %v3265_v3 }
 0xb29   : > { %v3822_v11 = vpop.eup %3821 }
 0xb2a   : > { %v3268_v34 = vmul.f32 %v3822_v11, %v3234_v55 }
 0xb2b   : > { %v3824_v48 = vpop.eup %3823 }
 0xb2c   : > { %v3276_v60 = vmul.f32 %v3274_v17, %v3268_v34  ;;  %v3269_v21 = vmul.f32 %v3824_v48, %v3235_v33 }
 0xb2e   : > { %3278 = vst [vmem:[%s298_s10] sm:$0xff] %v3276_v60  ;;  %v3277_v16 = vmul.f32 %v3274_v17, %v3269_v21 }
 0xb30   : > { %3279 = vst [vmem:[%s298_s10 + $0x8] sm:$0xff] %v3277_v16 }
 0xb31   : > { %3838 = shalt.err (!%p3835_p3)
}
 0xb32   : > { %s3839_s23 = scalar_lea.hbm %s3293_s18, 256  ;;  %s3843_s26 = scalar_lea.hbm %s5243_s8, 512 }
 0xb33   : > { %p3840_p4 = scmp.ne.s32.totalorder %s3293_s18, %s3839_s23  ;;  %p3844_p9 = scmp.lt.s32.totalorder %s3293_s18, %s5243_s8 }
 0xb34   : > { %p3845_p10 = scmp.lt.s32.totalorder %s3843_s26, %s3839_s23 }
 0xb35   : > { %p3841_p7 = pnand %p3840_p4, %p3976_p5 }
 0xb36   : > { %p3846_p11 = por %p3845_p10, %p3844_p9 }
 0xb37   : > { %p3842_p8 = pneg %p3841_p7 }
 0xb39   : > { %p3847_p12 = pnand %p3846_p11, %p3842_p8 }
 0xb3b   : > { %3850 = shalt.err (!%p3847_p12)
}
 0xb3c   : > { %3556 = dma.vmem_to_hbm [thread:$0]  (%p3976_p5), %s3296_s12, 256, %s3293_s18, %s3281_s19  }
 0xb3d PF: > { %p3562_p13 = scmp.ge.s32.totalorder %s3885_s30, 2  ;;  %s3307_s17 = sand.u32 1, %s3873_s27  }
 0xb3e   : > { %s3308_s20 = scalar_lea.sflag [#allocation3], %s3307_s17 }
 0xb3f   : > { %p3559_p0 = pnand %p3562_p13, %p3980_p6 }
 0xb41   : > { %p3560_p1 = pneg %p3559_p0 }
 0xb43   : > { %3868 = dma.done.wait (%p3560_p1), %s3308_s20, 256  }
 0xb44   : > { %3870 = vsyncadd (%p3560_p1), %s3308_s20, 4294967040  ;;  %p18_p2 = scmp.ge.s32.totalorder %s3963_s11, 4   ;;  %s5315_s27 = smov %s3877_s28 }
 0xb45   : > { %s5316_s28 = smov %s3881_s29  ;;  %s5317_s29 = smov %s3974_s14 }
 0xb46   : > { %s5318_s30 = smov %s3963_s11  ;;  %20 = sbr.rel (!%p18_p2) target bundleno = 3 (0x3), region = 87 }
 0xb4b   :  { %3313 = vsyncpa [#allocation3], 1 }
 0xb4c   :  { %3315 = vsyncpa [#allocation3 + $0x1], 1 }

</bundles_post_ra>
